<compile_context>
chip_gen: v7x
topology: tpu7x:2x2x1
jax: 0.10.0
libtpu: 0.0.40
codegen_flags: <defaults>
</compile_context>

<pallas_src>
import jax
import jax.numpy as jnp
from jax.experimental import pallas as pl
from jax.experimental.pallas import tpu as pltpu


def _round_up(x, m):
    return (x + m - 1) // m * m


def _encoder_kernel(self_ref, neigh_ref, lsh_ref, ws_ref, wn_ref, wl_ref,
                    out_ref):
    """One (batch-tile, embed-tile) block of the fused encoder.

    self_ref : (TB, Ks)   node's own features                     (compute dt)
    neigh_ref: (TB, Kn)   graph-neighbour feats, flattened S*D    (compute dt)
    lsh_ref  : (TB, Kl)   LSH-neighbour feats, flattened L*D      (compute dt)
    ws_ref   : (Ks, TE)   W_self.T, zero-padded                   (resident)
    wn_ref   : (Kn, TE)   (W_neigh/S).T repeated S times, padded  (resident)
    wl_ref   : (Kl, TE)   (W_lsh/L).T repeated L times, padded    (resident)
    out_ref  : (TB, TE)   relu(combined @ W.T) block, f32, lane-dense
    """
    acc = jnp.dot(self_ref[...], ws_ref[...],
                  preferred_element_type=jnp.float32)
    acc = acc + jnp.dot(neigh_ref[...], wn_ref[...],
                        preferred_element_type=jnp.float32)
    acc = acc + jnp.dot(lsh_ref[...], wl_ref[...],
                        preferred_element_type=jnp.float32)
    out_ref[...] = jnp.maximum(acc, 0.0).astype(out_ref.dtype)   # F.relu


def make_lsh_neighbours_encoder(weight, feat_dim, num_sample, n_lsh_neighbours,
                                *, compute_dtype=jnp.bfloat16, tile_b=256,
                                tile_e=512):
    """One-time packing of the (E, 3*D) weight; returns the forward closure."""
    E, three_d = weight.shape
    D, S, L = feat_dim, num_sample, n_lsh_neighbours
    assert three_d == 3 * D

    k_self = _round_up(D, 128)
    k_neigh = _round_up(S * D, 128)
    k_lsh = _round_up(L * D, 128)
    e_pad = _round_up(E, 128)
    tile_e = min(_round_up(tile_e, 128), e_pad)

    def _pack(w_block, scale, repeats, k_pad):
        # (E, d) torch-layout slice -> mean-folded, repeated, transposed,
        # zero-padded (k_pad, e_pad) slab in compute dtype (done once).
        wt = jnp.tile(w_block.astype(jnp.float32).T * scale, (repeats, 1))
        slab = jnp.zeros((k_pad, e_pad), jnp.float32)
        slab = slab.at[: wt.shape[0], :E].set(wt)
        return slab.astype(compute_dtype)

    w_self = _pack(weight[:, 0:D], 1.0, 1, k_self)
    w_neigh = _pack(weight[:, D:2 * D], 1.0 / S, S, k_neigh)
    w_lsh = _pack(weight[:, 2 * D:3 * D], 1.0 / L, L, k_lsh)

    k_total = k_self + k_neigh + k_lsh
    isz = jnp.dtype(compute_dtype).itemsize

    def forward(self_feats, neigh_gathered, lsh_gathered):
        B = self_feats.shape[0]
        assert self_feats.shape == (B, D)
        assert neigh_gathered.shape == (B, S, D)
        assert lsh_gathered.shape == (B, L, D)

        # Flatten the sampled-neighbour axis into the lane axis (contiguous
        # view), pad batch only to a sublane multiple, pad K dims to lanes.
        b_pad = _round_up(B, 8)

        def _prep(x, k_pad):
            x = x.reshape(B, -1).astype(compute_dtype)
            return jnp.pad(x, ((0, b_pad - B), (0, k_pad - x.shape[1])))

        sf = _prep(self_feats, k_self)
        nf = _prep(neigh_gathered, k_neigh)
        lf = _prep(lsh_gathered, k_lsh)

        # Batch tile: as large as requested / the batch allows, but keep the
        # grid >= 2 steps when possible so v7x's two TensorCores both work.
        tb = max(8, min(_round_up(tile_b, 8), b_pad))
        if b_pad >= 16:
            tb = min(tb, max(8, _round_up(pl.cdiv(b_pad, 2), 8)))

        # VMEM budget against the binding target (v7x: 64 MiB / TensorCore).
        vmem_cap = 56 * 1024 * 1024

        def _budget(t):
            act = 2 * t * k_total * isz        # double-buffered activations
            out = 2 * t * tile_e * 4           # double-buffered f32 output
            wgt = 2 * k_total * tile_e * isz   # conservative (double-buffered)
            return act + out + wgt

        while _budget(tb) > vmem_cap and tb > 8:
            tb = max(8, _round_up(tb // 2, 8))
        vmem_limit = int(min(max(_budget(tb) + (4 << 20), 8 << 20), 60 << 20))

        grid = (pl.cdiv(b_pad, tb), pl.cdiv(e_pad, tile_e))

        def _call(single_buffer_weights):
            if single_buffer_weights:
                # Weight block index is constant -> single-buffer it resident.
                w_specs = [pl.BlockSpec((k, tile_e), lambda i, j: (0, j),
                                        pipeline_mode=pl.Buffered(1))
                           for k in (k_self, k_neigh, k_lsh)]
            else:
                w_specs = [pl.BlockSpec((k, tile_e), lambda i, j: (0, j))
                           for k in (k_self, k_neigh, k_lsh)]
            return pl.pallas_call(
                _encoder_kernel,
                out_shape=jax.ShapeDtypeStruct((b_pad, e_pad), jnp.float32),
                grid_spec=pltpu.PrefetchScalarGridSpec(
                    num_scalar_prefetch=0,
                    grid=grid,
                    in_specs=[
                        pl.BlockSpec((tb, k_self), lambda i, j: (i, 0)),
                        pl.BlockSpec((tb, k_neigh), lambda i, j: (i, 0)),
                        pl.BlockSpec((tb, k_lsh), lambda i, j: (i, 0)),
                    ] + w_specs,
                    out_specs=pl.BlockSpec((tb, tile_e), lambda i, j: (i, j)),
                ),
                compiler_params=pltpu.CompilerParams(
                    dimension_semantics=("parallel", "parallel"),
                    vmem_limit_bytes=vmem_limit,
                ),
            )(sf, nf, lf, w_self, w_neigh, w_lsh)

        try:
            out = _call(single_buffer_weights=(grid[1] == 1))
        except Exception:
            # TODO(synk): this JAX build rejected pl.Buffered(1) single
            # buffering of the resident weight blocks; fall back to default
            # double-buffering (correctness identical, slightly more VMEM).
            out = _call(single_buffer_weights=False)

        # Drop padding; return the module's (embed_dim, batch) layout.
        return out[:B, :E].T

    return forward


def _xavier_uniform(key, shape):
    fan_out, fan_in = shape  # torch weight layout: (embed_dim, in_dim)
    bound = (6.0 / (fan_in + fan_out)) ** 0.5
    return jax.random.uniform(key, shape, jnp.float32, -bound, bound)


if __name__ == "__main__":
    # Small shapes consistent with the module.
    num_nodes = 256       # feature/embedding table size
    feat_dim = 32         # feature_dim
    embed_dim = 32        # embed_dim
    batch = 64            # len(nodes)
    num_sample = 10       # sampled graph neighbours per node
    n_lsh_neighbours = 5  # sampled LSH neighbours per node

    key = jax.random.PRNGKey(0)
    k_feat, k_w, k_nodes, k_adj, k_lsh = jax.random.split(key, 5)

    # features: nn.Embedding-like lookup table.
    feature_table = jax.random.normal(k_feat, (num_nodes, feat_dim), jnp.float32)
    # nn.Parameter(torch.FloatTensor(embed_dim, 3 * feat_dim)) + xavier_uniform.
    weight = _xavier_uniform(k_w, (embed_dim, 3 * feat_dim))

    # TODO(synk): adj_lists / lsh_neighbours random *set* sampling (dedup,
    # variable per-node count) has no clean Pallas equivalent; fixed-size
    # precomputed neighbour index tables stand in for the sampler, and the
    # embedding-row gather stays in plain JAX (an in-kernel DMA gather of
    # 32-float rows would be dominated by per-descriptor overhead at this
    # feature width).
    nodes = jax.random.randint(k_nodes, (batch,), 0, num_nodes)
    adj_idx = jax.random.randint(k_adj, (batch, num_sample), 0, num_nodes)
    lsh_idx = jax.random.randint(k_lsh, (batch, n_lsh_neighbours), 0, num_nodes)

    self_f32 = jnp.take(feature_table, nodes, axis=0)            # (B, D)
    neigh_f32 = jnp.take(feature_table, adj_idx, axis=0)         # (B, S, D)
    lsh_f32 = jnp.take(feature_table, lsh_idx, axis=0)           # (B, L, D)

    # Pure-JAX reference (exactly the PyTorch forward math, f32).
    combined = jnp.concatenate(
        [self_f32, neigh_f32.mean(axis=1), lsh_f32.mean(axis=1)], axis=1)
    ref = jnp.maximum(weight @ combined.T, 0.0)                  # (E, B)

    # 1) f32 compute path: validates the repeated / mean-folded weight and the
    #    fused-lane (B, S*D) rewrite exactly.
    enc_f32 = make_lsh_neighbours_encoder(
        weight, feat_dim, num_sample, n_lsh_neighbours,
        compute_dtype=jnp.float32, tile_b=256)
    out_f32 = jax.block_until_ready(enc_f32(self_f32, neigh_f32, lsh_f32))
    assert out_f32.shape == (embed_dim, batch)
    assert jnp.allclose(out_f32, ref, atol=1e-4, rtol=1e-4)

    # 2) bf16 compute path (f32 MXU accumulation, f32 ReLU/output). Feature
    #    table is pre-cast ONCE (init-time) so the gather already yields bf16.
    enc_bf16 = make_lsh_neighbours_encoder(
        weight, feat_dim, num_sample, n_lsh_neighbours,
        compute_dtype=jnp.bfloat16, tile_b=256)
    table_bf16 = feature_table.astype(jnp.bfloat16)
    out_bf16 = jax.block_until_ready(
        enc_bf16(jnp.take(table_bf16, nodes, axis=0),
                 jnp.take(table_bf16, adj_idx, axis=0),
                 jnp.take(table_bf16, lsh_idx, axis=0)))
    assert out_bf16.shape == (embed_dim, batch)
    assert jnp.allclose(out_bf16, ref, atol=5e-2, rtol=5e-2)

    print("KERNEL_OK")
</pallas_src>

<mosaic_0001>
module attributes {stable_mosaic.version = 11 : i64} {
  func.func @_encoder_kernel(%arg0: i32, %arg1: i32, %arg2: memref<32x128xf32, #tpu.memory_space<vmem>>, %arg3: memref<32x384xf32, #tpu.memory_space<vmem>>, %arg4: memref<32x256xf32, #tpu.memory_space<vmem>>, %arg5: memref<128x128xf32, #tpu.memory_space<vmem>>, %arg6: memref<384x128xf32, #tpu.memory_space<vmem>>, %arg7: memref<256x128xf32, #tpu.memory_space<vmem>>, %arg8: memref<32x128xf32, #tpu.memory_space<vmem>>) attributes {dimension_semantics = [#tpu.dimension_semantics<parallel>, #tpu.dimension_semantics<parallel>], iteration_bounds = array<i64: 2, 1>, scalar_prefetch = 0 : i64, scratch_operands = 0 : i64, tpu.core_type = #tpu.core_type<tc>, window_params = [{transform_indices = @transform_0, window_bounds = array<i64: 32, 128>}, {transform_indices = @transform_1, window_bounds = array<i64: 32, 384>}, {transform_indices = @transform_2, window_bounds = array<i64: 32, 256>}, {pipeline_mode = #tpu.pipeline_mode<synchronous>, transform_indices = @transform_3, window_bounds = array<i64: 128, 128>}, {pipeline_mode = #tpu.pipeline_mode<synchronous>, transform_indices = @transform_4, window_bounds = array<i64: 384, 128>}, {pipeline_mode = #tpu.pipeline_mode<synchronous>, transform_indices = @transform_5, window_bounds = array<i64: 256, 128>}, {transform_indices = @transform_6, window_bounds = array<i64: 32, 128>}]} {
    %c0 = arith.constant 0 : index
    %c0_0 = arith.constant 0 : index
    %0 = vector.load %arg2[%c0, %c0_0] : memref<32x128xf32, #tpu.memory_space<vmem>>, vector<32x128xf32>
    %c0_1 = arith.constant 0 : index
    %c0_2 = arith.constant 0 : index
    %1 = vector.load %arg5[%c0_1, %c0_2] : memref<128x128xf32, #tpu.memory_space<vmem>>, vector<128x128xf32>
    %cst = arith.constant dense<0.000000e+00> : vector<32x128xf32>
    %2 = tpu.matmul %0, %1, %cst {dimension_numbers = #tpu.dot_dimension_numbers<[1], [0], [0], [1], [0, 0, 1, 1], [], []>} : vector<32x128xf32>, vector<128x128xf32>, vector<32x128xf32> -> vector<32x128xf32>
    %c0_3 = arith.constant 0 : index
    %c0_4 = arith.constant 0 : index
    %3 = vector.load %arg3[%c0_3, %c0_4] : memref<32x384xf32, #tpu.memory_space<vmem>>, vector<32x384xf32>
    %c0_5 = arith.constant 0 : index
    %c0_6 = arith.constant 0 : index
    %4 = vector.load %arg6[%c0_5, %c0_6] : memref<384x128xf32, #tpu.memory_space<vmem>>, vector<384x128xf32>
    %cst_7 = arith.constant dense<0.000000e+00> : vector<32x128xf32>
    %5 = tpu.matmul %3, %4, %cst_7 {dimension_numbers = #tpu.dot_dimension_numbers<[1], [0], [0], [1], [0, 0, 1, 1], [], []>} : vector<32x384xf32>, vector<384x128xf32>, vector<32x128xf32> -> vector<32x128xf32>
    %6 = arith.addf %2, %5 : vector<32x128xf32>
    %c0_8 = arith.constant 0 : index
    %c0_9 = arith.constant 0 : index
    %7 = vector.load %arg4[%c0_8, %c0_9] : memref<32x256xf32, #tpu.memory_space<vmem>>, vector<32x256xf32>
    %c0_10 = arith.constant 0 : index
    %c0_11 = arith.constant 0 : index
    %8 = vector.load %arg7[%c0_10, %c0_11] : memref<256x128xf32, #tpu.memory_space<vmem>>, vector<256x128xf32>
    %cst_12 = arith.constant dense<0.000000e+00> : vector<32x128xf32>
    %9 = tpu.matmul %7, %8, %cst_12 {dimension_numbers = #tpu.dot_dimension_numbers<[1], [0], [0], [1], [0, 0, 1, 1], [], []>} : vector<32x256xf32>, vector<256x128xf32>, vector<32x128xf32> -> vector<32x128xf32>
    %10 = arith.addf %6, %9 : vector<32x128xf32>
    %cst_13 = arith.constant 0.000000e+00 : f32
    %11 = vector.broadcast %cst_13 : f32 to vector<32x128xf32>
    %12 = arith.maximumf %10, %11 : vector<32x128xf32>
    %c0_14 = arith.constant 0 : index
    %c0_15 = arith.constant 0 : index
    %13 = vector.load %arg8[%c0_14, %c0_15] : memref<32x128xf32, #tpu.memory_space<vmem>>, vector<32x128xf32>
    tpu.vector_store %arg8[%c0_14, %c0_15], %12 {strides = array<i32>} : memref<32x128xf32, #tpu.memory_space<vmem>>, vector<32x128xf32>,
    return
  }
  func.func @transform_0(%arg0: i32, %arg1: i32) -> (i32, i32) {
    %c0_i32 = arith.constant 0 : i32
    %c0_i32_0 = arith.constant 0 : i32
    return %arg0, %c0_i32 : i32, i32
  }
  func.func @transform_1(%arg0: i32, %arg1: i32) -> (i32, i32) {
    %c0_i32 = arith.constant 0 : i32
    %c0_i32_0 = arith.constant 0 : i32
    return %arg0, %c0_i32 : i32, i32
  }
  func.func @transform_2(%arg0: i32, %arg1: i32) -> (i32, i32) {
    %c0_i32 = arith.constant 0 : i32
    %c0_i32_0 = arith.constant 0 : i32
    return %arg0, %c0_i32 : i32, i32
  }
  func.func @transform_3(%arg0: i32, %arg1: i32) -> (i32, i32) {
    %c0_i32 = arith.constant 0 : i32
    %c0_i32_0 = arith.constant 0 : i32
    return %c0_i32, %arg1 : i32, i32
  }
  func.func @transform_4(%arg0: i32, %arg1: i32) -> (i32, i32) {
    %c0_i32 = arith.constant 0 : i32
    %c0_i32_0 = arith.constant 0 : i32
    return %c0_i32, %arg1 : i32, i32
  }
  func.func @transform_5(%arg0: i32, %arg1: i32) -> (i32, i32) {
    %c0_i32 = arith.constant 0 : i32
    %c0_i32_0 = arith.constant 0 : i32
    return %c0_i32, %arg1 : i32, i32
  }
  func.func @transform_6(%arg0: i32, %arg1: i32) -> (i32, i32) {
    %c0_i32 = arith.constant 0 : i32
    return %arg0, %arg1 : i32, i32
  }
}

module attributes {stable_mosaic.version = 11 : i64} {
  func.func @_encoder_kernel(%arg0: i32, %arg1: i32, %arg2: memref<32x128xf32, #tpu.memory_space<vmem>>, %arg3: memref<32x384xf32, #tpu.memory_space<vmem>>, %arg4: memref<32x256xf32, #tpu.memory_space<vmem>>, %arg5: memref<128x128xf32, #tpu.memory_space<vmem>>, %arg6: memref<384x128xf32, #tpu.memory_space<vmem>>, %arg7: memref<256x128xf32, #tpu.memory_space<vmem>>, %arg8: memref<32x128xf32, #tpu.memory_space<vmem>>) attributes {dimension_semantics = [#tpu.dimension_semantics<parallel>, #tpu.dimension_semantics<parallel>], iteration_bounds = array<i64: 2, 1>, scalar_prefetch = 0 : i64, scratch_operands = 0 : i64, tpu.core_type = #tpu.core_type<tc>, window_params = [{transform_indices = @transform_0, window_bounds = array<i64: 32, 128>}, {transform_indices = @transform_1, window_bounds = array<i64: 32, 384>}, {transform_indices = @transform_2, window_bounds = array<i64: 32, 256>}, {transform_indices = @transform_3, window_bounds = array<i64: 128, 128>}, {transform_indices = @transform_4, window_bounds = array<i64: 384, 128>}, {transform_indices = @transform_5, window_bounds = array<i64: 256, 128>}, {transform_indices = @transform_6, window_bounds = array<i64: 32, 128>}]} {
    %c0 = arith.constant 0 : index
    %c0_0 = arith.constant 0 : index
    %0 = vector.load %arg2[%c0, %c0_0] : memref<32x128xf32, #tpu.memory_space<vmem>>, vector<32x128xf32>
    %c0_1 = arith.constant 0 : index
    %c0_2 = arith.constant 0 : index
    %1 = vector.load %arg5[%c0_1, %c0_2] : memref<128x128xf32, #tpu.memory_space<vmem>>, vector<128x128xf32>
    %cst = arith.constant dense<0.000000e+00> : vector<32x128xf32>
    %2 = tpu.matmul %0, %1, %cst {dimension_numbers = #tpu.dot_dimension_numbers<[1], [0], [0], [1], [0, 0, 1, 1], [], []>} : vector<32x128xf32>, vector<128x128xf32>, vector<32x128xf32> -> vector<32x128xf32>
    %c0_3 = arith.constant 0 : index
    %c0_4 = arith.constant 0 : index
    %3 = vector.load %arg3[%c0_3, %c0_4] : memref<32x384xf32, #tpu.memory_space<vmem>>, vector<32x384xf32>
    %c0_5 = arith.constant 0 : index
    %c0_6 = arith.constant 0 : index
    %4 = vector.load %arg6[%c0_5, %c0_6] : memref<384x128xf32, #tpu.memory_space<vmem>>, vector<384x128xf32>
    %cst_7 = arith.constant dense<0.000000e+00> : vector<32x128xf32>
    %5 = tpu.matmul %3, %4, %cst_7 {dimension_numbers = #tpu.dot_dimension_numbers<[1], [0], [0], [1], [0, 0, 1, 1], [], []>} : vector<32x384xf32>, vector<384x128xf32>, vector<32x128xf32> -> vector<32x128xf32>
    %6 = arith.addf %2, %5 : vector<32x128xf32>
    %c0_8 = arith.constant 0 : index
    %c0_9 = arith.constant 0 : index
    %7 = vector.load %arg4[%c0_8, %c0_9] : memref<32x256xf32, #tpu.memory_space<vmem>>, vector<32x256xf32>
    %c0_10 = arith.constant 0 : index
    %c0_11 = arith.constant 0 : index
    %8 = vector.load %arg7[%c0_10, %c0_11] : memref<256x128xf32, #tpu.memory_space<vmem>>, vector<256x128xf32>
    %cst_12 = arith.constant dense<0.000000e+00> : vector<32x128xf32>
    %9 = tpu.matmul %7, %8, %cst_12 {dimension_numbers = #tpu.dot_dimension_numbers<[1], [0], [0], [1], [0, 0, 1, 1], [], []>} : vector<32x256xf32>, vector<256x128xf32>, vector<32x128xf32> -> vector<32x128xf32>
    %10 = arith.addf %6, %9 : vector<32x128xf32>
    %cst_13 = arith.constant 0.000000e+00 : f32
    %11 = vector.broadcast %cst_13 : f32 to vector<32x128xf32>
    %12 = arith.maximumf %10, %11 : vector<32x128xf32>
    %c0_14 = arith.constant 0 : index
    %c0_15 = arith.constant 0 : index
    %13 = vector.load %arg8[%c0_14, %c0_15] : memref<32x128xf32, #tpu.memory_space<vmem>>, vector<32x128xf32>
    tpu.vector_store %arg8[%c0_14, %c0_15], %12 {strides = array<i32>} : memref<32x128xf32, #tpu.memory_space<vmem>>, vector<32x128xf32>,
    return
  }
  func.func @transform_0(%arg0: i32, %arg1: i32) -> (i32, i32) {
    %c0_i32 = arith.constant 0 : i32
    %c0_i32_0 = arith.constant 0 : i32
    return %arg0, %c0_i32 : i32, i32
  }
  func.func @transform_1(%arg0: i32, %arg1: i32) -> (i32, i32) {
    %c0_i32 = arith.constant 0 : i32
    %c0_i32_0 = arith.constant 0 : i32
    return %arg0, %c0_i32 : i32, i32
  }
  func.func @transform_2(%arg0: i32, %arg1: i32) -> (i32, i32) {
    %c0_i32 = arith.constant 0 : i32
    %c0_i32_0 = arith.constant 0 : i32
    return %arg0, %c0_i32 : i32, i32
  }
  func.func @transform_3(%arg0: i32, %arg1: i32) -> (i32, i32) {
    %c0_i32 = arith.constant 0 : i32
    %c0_i32_0 = arith.constant 0 : i32
    return %c0_i32, %arg1 : i32, i32
  }
  func.func @transform_4(%arg0: i32, %arg1: i32) -> (i32, i32) {
    %c0_i32 = arith.constant 0 : i32
    %c0_i32_0 = arith.constant 0 : i32
    return %c0_i32, %arg1 : i32, i32
  }
  func.func @transform_5(%arg0: i32, %arg1: i32) -> (i32, i32) {
    %c0_i32 = arith.constant 0 : i32
    %c0_i32_0 = arith.constant 0 : i32
    return %c0_i32, %arg1 : i32, i32
  }
  func.func @transform_6(%arg0: i32, %arg1: i32) -> (i32, i32) {
    %c0_i32 = arith.constant 0 : i32
    return %arg0, %arg1 : i32, i32
  }
}

</mosaic_0001>

<bundles_post_ra>
// kernel: tpu_custom_call.1
= control target key start
LH: loop header
LB: loop body
LE: loop exit
PB: predicated region body
PF: predicated region fallthrough
CT: control target
= control target key end

     0   :  { %s2297_s0 = inlined_call_operand.hbm [shape: f32[64,128], index: 0, kind: input, shape index: {}]   ;;  %s2298_s1 = inlined_call_operand.hbm [shape: f32[64,384], index: 1, kind: input, shape index: {}]   ;;  %s2299_s2 = inlined_call_operand.hbm [shape: f32[64,256], index: 2, kind: input, shape index: {}]   ;;  %s2300_s3 = inlined_call_operand.hbm [shape: f32[128,128], index: 3, kind: input, shape index: {}]   ;;  %s2301_s4 = inlined_call_operand.hbm [shape: f32[384,128], index: 4, kind: input, shape index: {}]   ;;  %s2302_s5 = inlined_call_operand.hbm [shape: f32[256,128], index: 5, kind: input, shape index: {}]   ;;  %s2303_s6 = inlined_call_operand.hbm [shape: f32[64,128], index: 6, kind: output, shape index: {}]  }
   0x1   :  { %2325 = sst [smem:[#allocation25_spill]] %s2298_s1 }
   0x2   :  { %2326 = sst [smem:[#allocation26_spill]] %s2300_s3 }
   0x3   :  { %2327 = sst [smem:[#allocation27_spill]] %s2303_s6 }
   0x4   :  { %11 = vsyncpa [#allocation3], 0 }
   0x5   :  { %13 = vsyncpa [#allocation3 + $0x1], 0 }
   0x6   :  { %14 = vsyncpa [#allocation6], 0 }
   0x7   :  { %16 = vsyncpa [#allocation6 + $0x1], 0 }
   0x8   :  { %17 = vsyncpa [#allocation9], 0 }
   0x9   :  { %18 = vsyncpa [#allocation12], 0 }
   0xa   :  { %19 = vsyncpa [#allocation4], 0 }
   0xb   :  { %21 = vsyncpa [#allocation4 + $0x1], 0  ;;  %s1887_s21 = smov 0   ;;  %s1889_s22 = smov 0  }
   0xc   :  { %s1891_s23 = smov 0   ;;  %s1893_s24 = smov 0  }
   0xd   :  { %s1895_s25 = smov 0   ;;  %s1897_s26 = smov 0  }
   0xe LB: > { %2328 = sst [smem:[#allocation19_spill]] %s1815_s21  ;;  %s1918_s27 = sadd.s32 4294967295, %s1835_s26   ;;  %s1835_s26 = sphi %s1897_s26, %s27_s26   ;;  %s1831_s25 = sphi %s1895_s25, %s2372_s25   ;;  %s1827_s24 = sphi %s1893_s24, %s2371_s24   ;;  %s1823_s23 = sphi %s1891_s23, %s2367_s23   ;;  %s1819_s22 = sphi %s1889_s22, %s2370_s22   ;;  %s1815_s21 = sphi %s1887_s21, %s2369_s21  }
   0xf   : > { %2329 = sst [smem:[#allocation20_spill]] %s1823_s23  ;;  %s1081_s28 = sadd.s32 4294967294, %s1835_s26  }
  0x10   : > { %p53_p0 = scmp.ne.s32.totalorder %s1823_s23, %s1819_s22  ;;  %p54_p1 = scmp.eq.s32.totalorder %s1835_s26, 0 }
  0x11   : > { %p59_p2 = scmp.ne.s32.totalorder %s1819_s22, %s1815_s21  ;;  %p2305_p3 = scmp.eq.s32.totalorder %s1918_s27, 0 }
  0x12   : > { %p215_p4 = scmp.eq.s32.totalorder %s1918_s27, 1  ;;  %p1929_p5 = por %p54_p1, %p53_p0 }
  0x13   : > { %p221_p6 = scmp.eq.s32.totalorder %s1081_s28, 1  ;;  %p1935_p7 = por %p2305_p3, %p59_p2 }
  0x14   : > { %p1939_p8 = por %p215_p4, %p53_p0  ;;  %p1082_p10 = scmp.ge.s32.totalorder %s1835_s26, 1 }
  0x15   : > { %s2331_s7 = scalar_select %p1935_p7, 1, 0 }
  0x16   : > { %s2332_s8 = scalar_select %p1939_p8, 1, 0 }
  0x17   : > { %p1943_p9 = por %p221_p6, %p59_p2  ;;  %p228_p11 = scmp.lt.s32.totalorder %s1835_s26, 3 }
  0x18   : > { %2333 = sst [smem:[#allocation21_spill]] %s2332_s8  ;;  %s1837_s11 = smov [#allocation8]  }
  0x19   : > { %s2334_s9 = scalar_select %p1943_p9, 1, 0 }
  0x1a   : > { %p1949_p12 = pnand %p1082_p10, %p228_p11  ;;  %s242_s12 = sshll.u32 %s1837_s11, 4  ;;  %s1953_s12 = int_to_ptr.vmem [resolvable:$true] %s242_s12 }
  0x1b   : > { %2335 = sst [smem:[#allocation22_spill]] %s2334_s9  ;;  %s39_s14 = sadd.s32 1, %s1831_s25 }
  0x1c   : > { %s2336_s10 = scalar_select %p1949_p12, 1, 0 }
  0x1d   : > { %p1476_p13 = pneg %p1949_p12  ;;  %s1967_s15 = sand.u32 1, %s1823_s23  }
  0x1e   : > { %p1969_p4 = scmp.ge.s32.totalorder %s39_s14, 2  ;;  %s2339_s3 = sld [smem:[#allocation26_spill]] }
  0x1f   : > { %p1961_p2 = pnand %p1476_p13, %p2305_p3 }
  0x21   : > { %s2337_s13 = scalar_select %p1961_p2, 1, 0 }
  0x22   : > { %p1981_p10 = pneg %p1961_p2 }
  0x24   : > { %s1567_s19 = scalar_lea.hbm %s2339_s3, 2048 }
  0x25   : > { %p1568_p6 = scmp.ne.s32.totalorder %s2339_s3, %s1567_s19  ;;  %p1574_p0 = scmp.lt.u32.totalorder %s1567_s19, %s2339_s3 }
  0x26   : > { %s2340_s11 = scalar_select %p1981_p10, 1, 0 }
  0x27   : > { %p1570_p11 = pnand %p1981_p10, %p1568_p6 }
  0x29   : > { %p1571_p13 = pneg %p1570_p11 }
  0x2b   : > { %p1576_p3 = pnand %p1574_p0, %p1571_p13 }
  0x2d   : > { %1579 = shalt.err (!%p1576_p3)
}
  0x2e   : > { %s1580_s17 = scalar_lea.vmem %s1953_s12, 2048  ;;  %p1588_p7 = scmp.lt.s32.totalorder %s1953_s12, %s1953_s12 }
  0x2f   : > { %p1581_p1 = scmp.ne.s32.totalorder %s1953_s12, %s1580_s17  ;;  %p1589_p12 = scmp.lt.s32.totalorder %s1580_s17, %s1580_s17 }
  0x31   : > { %p1583_p9 = pnand %p1581_p1, %p1981_p10  ;;  %p1590_p6 = por %p1589_p12, %p1588_p7 }
  0x33   : > { %p1584_p8 = pneg %p1583_p9 }
  0x35   : > { %p1591_p11 = pnand %p1590_p6, %p1584_p8 }
  0x37   : > { %1594 = shalt.err (!%p1591_p11)
}
  0x38   : > { %s2313_s18 = smov 128   ;;  %s2315_s29 = smov 8  }
  0x39   : > { %1479 = dma.hbm_to_vmem [thread:$0]  (!%p1961_p2), %s2339_s3, 2048, %s1953_s12, [#allocation9], %s2313_s18, %s2313_s18, %s2315_s29  }
  0x3a   : > { %s2374_s14 = smov (%p1969_p4, %s39_s14), 0  ;;  %p2342_p3 = scmp.lt.s32.totalorder %s1835_s26, 2 }
  0x3b   : > { %2341 = sst [smem:[#allocation23_spill]] %s2374_s14  ;;  %s307_s28 = sand.u32 1, %s1835_s26  }
  0x3c   : > { %p2013_p7 = pnand %p2342_p3, %p1929_p5  ;;  %s43_s17 = ssub.s32 %s1831_s25, %s2374_s14 }
  0x3d   : > { %p44_p8 = scmp.eq.s32.totalorder %s43_s17, 0  ;;  %s1453_s21 = smul.u32 96, %s1967_s15 }
  0x3e   : > { %s2343_s20 = scalar_select %p2013_p7, 1, 0 }
  0x3f   : > { %s2344_s6 = sadd.s32 1, %s1823_s23  ;;  %s1454_s9 = smul.u32 1536, %s1831_s25 }
  0x40   : > { %s2024_s8 = scalar_select %p44_p8, %s1823_s23, %s2344_s6  }
  0x41   : > { %s311_s12 = scalar_lea.vmem [#allocation5], %s1453_s21  ;;  %s2346_s1 = sld [smem:[#allocation25_spill]] }
  0x42   : > { %2345 = sst [smem:[#allocation24_spill]] %s2024_s8  ;;  %s319_s16 = sshll.u32 %s311_s12, 4  ;;  %s2032_s16 = int_to_ptr.vmem [resolvable:$true] %s319_s16 }
  0x43   : > { %s2034_s29 = scalar_lea.sflag [#allocation6], %s307_s28  ;;  %p2040_p9 = pneg %p2013_p7 }
  0x47   : > { %s2030_s30 = scalar_lea.hbm %s2346_s1, %s1454_s9  ;;  %s1600_s9 = scalar_lea.hbm %s2346_s1, 3072 }
  0x48   : > { %s1595_s17 = scalar_lea.hbm %s2030_s30, 1536  ;;  %p1601_p1 = scmp.lt.u32.totalorder %s2030_s30, %s2346_s1 }
  0x49   : > { %p1596_p5 = scmp.ne.s32.totalorder %s2030_s30, %s1595_s17  ;;  %p1602_p4 = scmp.lt.u32.totalorder %s1600_s9, %s1595_s17 }
  0x4a   : > { %p1604_p6 = scmp.lt.u32.totalorder %s1595_s17, %s2030_s30 }
  0x4b   : > { %p1598_p12 = pnand %p2040_p9, %p1596_p5  ;;  %p1603_p13 = por %p1602_p4, %p1601_p1 }
  0x4d   : > { %p1599_p0 = pneg %p1598_p12  ;;  %p1605_p11 = por %p1604_p6, %p1603_p13 }
  0x4f   : > { %p1606_p3 = pnand %p1605_p11, %p1599_p0 }
  0x51   : > { %1609 = shalt.err (!%p1606_p3)
}
  0x52   : > { %s1610_s28 = scalar_lea.vmem %s2032_s16, 1536  ;;  %s1840_s21 = smov [#allocation5]  }
  0x53   : > { %p1611_p8 = scmp.ne.s32.totalorder %s2032_s16, %s1610_s28  ;;  %s1615_s18 = sshll.u32 %s1840_s21, 4  ;;  %s1616_s18 = int_to_ptr.vmem [resolvable:$false] %s1615_s18 }
  0x54   : > { %s1617_s12 = scalar_lea.vmem %s1616_s18, 3072  ;;  %p1618_p2 = scmp.lt.s32.totalorder %s2032_s16, %s1616_s18 }
  0x55   : > { %p1613_p5 = pnand %p1611_p8, %p2040_p9  ;;  %p1619_p10 = scmp.lt.s32.totalorder %s1617_s12, %s1610_s28 }
  0x57   : > { %p1614_p12 = pneg %p1613_p5  ;;  %p1620_p1 = por %p1619_p10, %p1618_p2 }
  0x59   : > { %p1621_p4 = pnand %p1620_p1, %p1614_p12 }
  0x5b   : > { %1624 = shalt.err (!%p1621_p4)
}
  0x5c   : > { %s1841_s17 = smov 384   ;;  %s1842_s9 = smov 24  }
  0x5d   : > { %1492 = dma.hbm_to_vmem [thread:$0]  (!%p2013_p7), %s2030_s30, 1536, %s2032_s16, %s2034_s29, %s1841_s17, %s1841_s17, %s1842_s9  }
  0x5e   : > { %s1843_s19 = smov [#allocation10]   ;;  %s1844_s3 = smov [#allocation11]  }
  0x5f   : > { %s257_s1 = sshll.u32 %s1843_s19, 4  ;;  %s272_s21 = sshll.u32 %s1844_s3, 4  ;;  %s258_s1 = int_to_ptr.vmem [resolvable:$true] %s257_s1  ;;  %s2064_s21 = int_to_ptr.vmem [resolvable:$true] %s272_s21 }
  0x60   : > { %s1625_s12 = scalar_lea.hbm %s2301_s4, 6144  ;;  %p2348_p10 = scmp.ne.s32.totalorder %s2340_s11, 0 }
  0x61   : > { %p1626_p2 = scmp.ne.s32.totalorder %s2301_s4, %s1625_s12  ;;  %p1632_p6 = scmp.lt.u32.totalorder %s1625_s12, %s2301_s4 }
  0x63   : > { %p1628_p0 = pnand %p1626_p2, %p2348_p10 }
  0x65   : > { %p1629_p13 = pneg %p1628_p0 }
  0x67   : > { %p1634_p11 = pnand %p1632_p6, %p1629_p13 }
  0x69   : > { %1637 = shalt.err (!%p1634_p11)
}
  0x6a   : > { %s1638_s3 = scalar_lea.vmem %s258_s1, 6144  ;;  %p1646_p12 = scmp.lt.s32.totalorder %s258_s1, %s258_s1 }
  0x6b   : > { %p1639_p3 = scmp.ne.s32.totalorder %s258_s1, %s1638_s3  ;;  %p1647_p1 = scmp.lt.s32.totalorder %s1638_s3, %s1638_s3 }
  0x6d   : > { %p1641_p8 = pnand %p1639_p3, %p2348_p10  ;;  %p1648_p4 = por %p1647_p1, %p1646_p12 }
  0x6f   : > { %p1642_p5 = pneg %p1641_p8 }
  0x71   : > { %p1649_p7 = pnand %p1648_p4, %p1642_p5 }
  0x73   : > { %1652 = shalt.err (!%p1649_p7)
}
  0x74   : > { %p2349_p2 = scmp.ne.s32.totalorder %s2337_s13, 0  ;;  %s2350_s8 = smov 8  }
  0x75   : > { %s2351_s14 = smov 128   ;;  %s1653_s19 = scalar_lea.hbm %s2302_s5, 4096 }
  0x76   : > { %1482 = dma.hbm_to_vmem [thread:$0]  (!%p2349_p2), %s2301_s4, 6144, %s258_s1, [#allocation9], %s2351_s14, %s2351_s14, %s2350_s8  }
  0x77   : > { %p1654_p0 = scmp.ne.s32.totalorder %s2302_s5, %s1653_s19  ;;  %p1660_p6 = scmp.lt.u32.totalorder %s1653_s19, %s2302_s5 }
  0x79   : > { %p1656_p7 = pnand %p1654_p0, %p2348_p10 }
  0x7b   : > { %p1657_p13 = pneg %p1656_p7 }
  0x7d   : > { %p1662_p11 = pnand %p1660_p6, %p1657_p13 }
  0x7f   : > { %1665 = shalt.err (!%p1662_p11)
}
  0x80   : > { %s1666_s1 = scalar_lea.vmem %s2064_s21, 4096  ;;  %p1674_p12 = scmp.lt.s32.totalorder %s2064_s21, %s2064_s21 }
  0x81   : > { %p1667_p3 = scmp.ne.s32.totalorder %s2064_s21, %s1666_s1  ;;  %p1675_p1 = scmp.lt.s32.totalorder %s1666_s1, %s1666_s1 }
  0x83   : > { %p1669_p8 = pnand %p1667_p3, %p2348_p10  ;;  %p1676_p4 = por %p1675_p1, %p1674_p12 }
  0x85   : > { %p1670_p5 = pneg %p1669_p8 }
  0x87   : > { %p1677_p0 = pnand %p1676_p4, %p1670_p5 }
  0x89   : > { %1680 = shalt.err (!%p1677_p0)
}
  0x8a   : > { %1485 = dma.hbm_to_vmem [thread:$0]  (!%p2349_p2), %s2302_s5, 4096, %s2064_s21, [#allocation12], %s2351_s14, %s2351_s14, %s2350_s8  }
  0x8b   : > { %s1087_s11 = sshll.u32 %s1967_s15, 5  ;;  %s1109_s30 = sshll.u32 %s1831_s25, 9 }
  0x8c   : > { %s2118_s19 = scalar_lea.hbm %s2297_s0, %s1109_s30  ;;  %s290_s13 = scalar_lea.vmem [#allocation2], %s1087_s11 }
  0x8d   : > { %s297_s28 = sshll.u32 %s290_s13, 4  ;;  %s1093_s18 = sshll.u32 %s1967_s15, 6  ;;  %s2120_s28 = int_to_ptr.vmem [resolvable:$true] %s297_s28 }
  0x8e   : > { %s287_s12 = scalar_lea.sflag [#allocation3], %s1967_s15  ;;  %s1681_s16 = scalar_lea.hbm %s2118_s19, 512 }
  0x8f   : > { %p1682_p10 = scmp.ne.s32.totalorder %s2118_s19, %s1681_s16  ;;  %s1686_s3 = scalar_lea.hbm %s2297_s0, 1024 }
  0x90   : > { %p1687_p13 = scmp.lt.u32.totalorder %s2118_s19, %s2297_s0  ;;  %p1688_p6 = scmp.lt.u32.totalorder %s1686_s3, %s1681_s16 }
  0x91   : > { %p1684_p2 = pnand %p1682_p10, %p2040_p9  ;;  %p1690_p3 = scmp.lt.u32.totalorder %s1681_s16, %s2118_s19 }
  0x92   : > { %p1689_p11 = por %p1688_p6, %p1687_p13 }
  0x93   : > { %p1685_p7 = pneg %p1684_p2 }
  0x94   : > { %p1691_p8 = por %p1690_p3, %p1689_p11 }
  0x96   : > { %p1692_p5 = pnand %p1691_p8, %p1685_p7 }
  0x98   : > { %1695 = shalt.err (!%p1692_p5)
}
  0x99   : > { %s1696_s11 = scalar_lea.vmem %s2120_s28, 512  ;;  %s1845_s17 = smov [#allocation2]  }
  0x9a   : > { %p1697_p12 = scmp.ne.s32.totalorder %s2120_s28, %s1696_s11  ;;  %s1701_s9 = sshll.u32 %s1845_s17, 4  ;;  %s1702_s9 = int_to_ptr.vmem [resolvable:$false] %s1701_s9 }
  0x9b   : > { %s1703_s13 = scalar_lea.vmem %s1702_s9, 1024  ;;  %p1704_p0 = scmp.lt.s32.totalorder %s2120_s28, %s1702_s9 }
  0x9c   : > { %p1699_p1 = pnand %p1697_p12, %p2040_p9  ;;  %p1705_p10 = scmp.lt.s32.totalorder %s1703_s13, %s1696_s11 }
  0x9e   : > { %p1700_p4 = pneg %p1699_p1  ;;  %p1706_p2 = por %p1705_p10, %p1704_p0 }
  0xa0   : > { %p1707_p13 = pnand %p1706_p2, %p1700_p4 }
  0xa2   : > { %1710 = shalt.err (!%p1707_p13)
}
  0xa3   : > { %p2352_p7 = scmp.ne.s32.totalorder %s2343_s20, 0  ;;  %s1111_s16 = sshll.u32 %s1831_s25, 10 }
  0xa4   : > { %s2154_s3 = scalar_lea.hbm %s2299_s2, %s1111_s16  ;;  %s333_s23 = scalar_lea.vmem [#allocation7], %s1093_s18 }
  0xa5   : > { %1489 = dma.hbm_to_vmem [thread:$0]  (!%p2352_p7), %s2118_s19, 512, %s2120_s28, %s287_s12, %s2351_s14, %s2351_s14, %s2350_s8  }
  0xa6   : > { %s341_s30 = sshll.u32 %s333_s23, 4  ;;  %s1711_s11 = scalar_lea.hbm %s2154_s3, 1024  ;;  %s2158_s30 = int_to_ptr.vmem [resolvable:$true] %s341_s30 }
  0xa7   : > { %p1712_p6 = scmp.ne.s32.totalorder %s2154_s3, %s1711_s11  ;;  %s1716_s19 = scalar_lea.hbm %s2299_s2, 2048 }
  0xa8   : > { %p1717_p8 = scmp.lt.u32.totalorder %s2154_s3, %s2299_s2  ;;  %p1718_p5 = scmp.lt.u32.totalorder %s1716_s19, %s1711_s11 }
  0xa9   : > { %p1714_p11 = pnand %p1712_p6, %p2040_p9  ;;  %p1720_p1 = scmp.lt.u32.totalorder %s1711_s11, %s2154_s3 }
  0xaa   : > { %p1719_p12 = por %p1718_p5, %p1717_p8 }
  0xab   : > { %p1715_p3 = pneg %p1714_p11 }
  0xac   : > { %p1721_p4 = por %p1720_p1, %p1719_p12 }
  0xae   : > { %p1722_p0 = pnand %p1721_p4, %p1715_p3 }
  0xb0   : > { %1725 = shalt.err (!%p1722_p0)
}
  0xb1   : > { %s1726_s15 = scalar_lea.vmem %s2158_s30, 1024  ;;  %s1846_s18 = smov [#allocation7]  }
  0xb2   : > { %p1727_p10 = scmp.ne.s32.totalorder %s2158_s30, %s1726_s15  ;;  %s1731_s17 = sshll.u32 %s1846_s18, 4  ;;  %s1732_s17 = int_to_ptr.vmem [resolvable:$false] %s1731_s17 }
  0xb3   : > { %s1733_s9 = scalar_lea.vmem %s1732_s17, 2048  ;;  %p1734_p6 = scmp.lt.s32.totalorder %s2158_s30, %s1732_s17 }
  0xb4   : > { %p1729_p2 = pnand %p1727_p10, %p2040_p9  ;;  %p1735_p11 = scmp.lt.s32.totalorder %s1733_s9, %s1726_s15 }
  0xb6   : > { %p1730_p13 = pneg %p1729_p2  ;;  %p1736_p8 = por %p1735_p11, %p1734_p6 }
  0xb8   : > { %p1737_p5 = pnand %p1736_p8, %p1730_p13 }
  0xba   : > { %1740 = shalt.err (!%p1737_p5)
}
  0xbb   : > { %s1847_s13 = smov 256   ;;  %s1848_s16 = smov 16  }
  0xbc   : > { %1495 = dma.hbm_to_vmem [thread:$0]  (!%p2352_p7), %s2154_s3, 1024, %s2158_s30, %s2034_s29, %s1847_s13, %s1847_s13, %s1848_s16  }
  0xbd   : > { %p2353_p9 = scmp.ne.s32.totalorder %s2336_s10, 0 }
  0xbe   : > { %s2185_s6 = sand.u32 (!%p2353_p9), 1, %s1819_s22   ;;  %p2354_p3 = scmp.ne.s32.totalorder (!%p2353_p9), %s2331_s7, 0 }
  0xbf   : > { %353 = sbr.rel (%p2353_p9) target bundleno = 523 (0x20b), region = 44  ;;  %s1098_s21 = sshll.u32 (!%p2353_p9), %s2185_s6, 5 }
  0xc0   : > { %s356_s1 = scalar_lea.sflag (!%p2353_p9), [#allocation3], %s2185_s6  ;;  %s2191_s23 = scalar_lea.vmem (!%p2353_p9), [#allocation2], %s1098_s21 }
  0xc6   : > { %1794 = dma.done.wait (%p2354_p3), %s356_s1, 512  }
  0xc7   : > { %1796 = vsyncadd (%p2354_p3), %s356_s1, 4294966784  ;;  %s364_s10 = sand.u32 1, %s1918_s27   ;;  %s1455_s29 = smul.u32 96, %s2185_s6 }
  0xc8   : > { %s365_s20 = scalar_lea.sflag [#allocation6], %s364_s10 }
  0xc9   : > { %s2199_s3 = scalar_lea.vmem [#allocation5], %s1455_s29 }
  0xca   : > { %1798 = dma.done.wait (%p2354_p3), %s365_s20, 2560  }
  0xcb   : > { %1800 = vsyncadd (%p2354_p3), %s365_s20, 4294964736  ;;  %s1099_s30 = sshll.u32 %s2185_s6, 6  ;;  %p2355_p7 = scmp.eq.s32.totalorder %s1918_s27, 0 }
  0xcc   : > { %s2206_s11 = scalar_lea.vmem [#allocation7], %s1099_s30 }
  0xcd   : > { %1802 = dma.done.wait (%p2355_p7), [#allocation9], 8192   ;;  %p2356_p12 = pmov %p2355_p7 }
  0xce   : > { %p2357_p1 = pmov %p2355_p7 }
  0xcf   : > { %1804 = vsyncadd (%p2356_p12), [#allocation9], 4294959104 }
  0xd0   : > { %1806 = dma.done.wait (%p2357_p1), [#allocation12], 4096   ;;  %p2358_p4 = pmov %p2357_p1 }
  0xd1   : > { %v480_v0 = vld [vmem:[#allocation10 + $0x80] sm:$0xff]  ;;  %v481_v1 = vld [vmem:[#allocation10 + $0x88] sm:$0xff]  ;;  %v482_v9 = vld [vmem:[#allocation10 + $0x90] sm:$0xff]  ;;  %s427_s27 = scalar_lea.vmem [#allocation13], %s1098_s21  ;;  %s2359_s7 = sld [smem:[#allocation21_spill]] }
  0xd2   : > { %1808 = vsyncadd (%p2358_p4), [#allocation12], 4294963200  ;;  %v496_v2 = vld [vmem:[#allocation10 + $0x100] sm:$0xff]  ;;  %v1317_v3 = vpack.c.bf16 %v481_v1, %v480_v0  ;;  %v497_v4 = vld [vmem:[#allocation10 + $0x108] sm:$0xff]  ;;  %s919_s8 = sshll.u32 %s427_s27, 4  ;;  %s1112_s14 = sshll.u32 %s1827_s24, 9  ;;  %s2243_s8 = int_to_ptr.vmem [resolvable:$true] %s919_s8 }
  0xd3   : > { %v464_v5 = vld [vmem:[#allocation10] sm:$0xff]  ;;  %v465_v6 = vld [vmem:[#allocation10 + $0x8] sm:$0xff]  ;;  %v1349_v7 = vpack.c.bf16 %v497_v4, %v496_v2  ;;  %v483_v10 = vld [vmem:[#allocation10 + $0x98] sm:$0xff]  ;;  %s2360_s12 = sld [smem:[#allocation27_spill]]  ;;  %s905_s18 = scalar_lea.sflag [#allocation4], %s2185_s6 }
  0xd4   : > { %v1319_v8 = vpack.c.bf16 %v465_v6, %v464_v5  ;;  %v498_v11 = vld [vmem:[#allocation10 + $0x110] sm:$0xff]  ;;  %1318 = vmatprep.subr.bf16.mxu0 %v1317_v3  ;;  %v1321_v12 = vpack.c.bf16 %v483_v10, %v482_v9  ;;  %v499_v13 = vld [vmem:[#allocation10 + $0x118] sm:$0xff]  ;;  %v484_v18 = vld [vmem:[#allocation10 + $0xa0] sm:$0xff]  ;;  %s1741_s17 = scalar_lea.vmem %s2243_s8, 512  ;;  %s1849_s24 = smov [#allocation13]  }
  0xd5   : > { %v466_v14 = vld [vmem:[#allocation10 + $0x10] sm:$0xff]  ;;  %v467_v15 = vld [vmem:[#allocation10 + $0x18] sm:$0xff]  ;;  %1350 = vmatprep.subr.bf16.mxu1 %v1349_v7  ;;  %v1353_v16 = vpack.c.bf16 %v499_v13, %v498_v11  ;;  %v485_v19 = vld [vmem:[#allocation10 + $0xa8] sm:$0xff]  ;;  %p1742_p0 = scmp.ne.s32.totalorder %s2243_s8, %s1741_s17  ;;  %s1745_s9 = sshll.u32 %s1849_s24, 4  ;;  %s1746_s9 = int_to_ptr.vmem [resolvable:$false] %s1745_s9 }
  0xd6   : > { %1320 = vmatpush3.bf16.msra.mxu0 %v1319_v8  ;;  %v1323_v17 = vpack.c.bf16 %v467_v15, %v466_v14  ;;  %v500_v20 = vld [vmem:[#allocation10 + $0x120] sm:$0xff]  ;;  %1352 = vmatpush3.bf16.msra.mxu1 %v1349_v7  ;;  %v1325_v21 = vpack.c.bf16 %v485_v19, %v484_v18  ;;  %v501_v22 = vld [vmem:[#allocation10 + $0x128] sm:$0xff]  ;;  %v486_v26 = vld [vmem:[#allocation10 + $0xb0] sm:$0xff]  ;;  %s1747_s13 = scalar_lea.vmem %s1746_s9, 1024  ;;  %p1748_p6 = scmp.lt.s32.totalorder %s2243_s8, %s1746_s9 }
  0xd7   : > { %1322 = vmatprep.subr.bf16.mxu0 %v1321_v12  ;;  %v468_v23 = vld [vmem:[#allocation10 + $0x20] sm:$0xff]  ;;  %v469_v24 = vld [vmem:[#allocation10 + $0x28] sm:$0xff]  ;;  %1354 = vmatprep.subr.bf16.mxu1 %v1353_v16  ;;  %v1357_v25 = vpack.c.bf16 %v501_v22, %v500_v20  ;;  %v487_v27 = vld [vmem:[#allocation10 + $0xb8] sm:$0xff]  ;;  %p2361_p10 = scmp.ne.s32.totalorder %s2359_s7, 0  ;;  %p1749_p11 = scmp.lt.s32.totalorder %s1747_s13, %s1741_s17 }
  0xd8   : > { %v502_v28 = vld [vmem:[#allocation10 + $0x130] sm:$0xff]  ;;  %v503_v29 = vld [vmem:[#allocation10 + $0x138] sm:$0xff]  ;;  %v1327_v30 = vpack.c.bf16 %v469_v24, %v468_v23  ;;  %v1329_v31 = vpack.c.bf16 %v487_v27, %v486_v26  ;;  %v488_v35 = vld [vmem:[#allocation10 + $0xc0] sm:$0xff] }
  0xd9   : > { %v470_v32 = vld [vmem:[#allocation10 + $0x30] sm:$0xff]  ;;  %v471_v33 = vld [vmem:[#allocation10 + $0x38] sm:$0xff]  ;;  %v1361_v34 = vpack.c.bf16 %v503_v29, %v502_v28  ;;  %v489_v36 = vld [vmem:[#allocation10 + $0xc8] sm:$0xff]  ;;  %s2248_s15 = scalar_lea.hbm %s2360_s12, %s1112_s14  ;;  %p1743_p2 = pnand %p1742_p0, %p2361_p10 }
  0xda   : > { %1324 = vmatpush3.bf16.msra.mxu0 %v1323_v17  ;;  %1356 = vmatpush3.bf16.msra.mxu1 %v1353_v16  ;;  %v504_v37 = vld [vmem:[#allocation10 + $0x140] sm:$0xff]  ;;  %v505_v38 = vld [vmem:[#allocation10 + $0x148] sm:$0xff]  ;;  %v1331_v39 = vpack.c.bf16 %v471_v33, %v470_v32  ;;  %v1333_v40 = vpack.c.bf16 %v489_v36, %v488_v35  ;;  %v490_v44 = vld [vmem:[#allocation10 + $0xd0] sm:$0xff]  ;;  %p1750_p8 = por %p1749_p11, %p1748_p6 }
  0xdb   : > { %1326 = vmatprep.subr.bf16.mxu0 %v1325_v21  ;;  %1358 = vmatprep.subr.bf16.mxu1 %v1357_v25  ;;  %v472_v41 = vld [vmem:[#allocation10 + $0x40] sm:$0xff]  ;;  %v473_v42 = vld [vmem:[#allocation10 + $0x48] sm:$0xff]  ;;  %v1365_v43 = vpack.c.bf16 %v505_v38, %v504_v37  ;;  %v491_v45 = vld [vmem:[#allocation10 + $0xd8] sm:$0xff]  ;;  %p1744_p13 = pneg %p1743_p2 }
  0xdc   : > { %v506_v46 = vld [vmem:[#allocation10 + $0x150] sm:$0xff]  ;;  %v507_v47 = vld [vmem:[#allocation10 + $0x158] sm:$0xff]  ;;  %v1335_v48 = vpack.c.bf16 %v473_v42, %v472_v41  ;;  %v453_v49 = vld [vmem:[%s2199_s3 + $0x8] sm:$0xff]  ;;  %v1337_v51 = vpack.c.bf16 %v491_v45, %v490_v44 }
  0xdd   : > { %v454_v50 = vld [vmem:[%s2199_s3 + $0x10] sm:$0xff]  ;;  %v475_v53 = vld [vmem:[#allocation10 + $0x58] sm:$0xff]  ;;  %v1369_v54 = vpack.c.bf16 %v507_v47, %v506_v46  ;;  %v492_v55 = vld [vmem:[#allocation10 + $0xe0] sm:$0xff]  ;;  %576 = vmatprep.mubr.f32.mxu0 %v453_v49  ;;  %p1751_p5 = pnand %p1750_p8, %p1744_p13 }
  0xde   : > { %1328 = vmatpush3.bf16.msra.mxu0 %v1327_v30  ;;  %1360 = vmatpush3.bf16.msra.mxu1 %v1357_v25  ;;  %v474_v52 = vld [vmem:[#allocation10 + $0x50] sm:$0xff]  ;;  %v493_v56 = vld [vmem:[#allocation10 + $0xe8] sm:$0xff]  ;;  %v508_v57 = vld [vmem:[#allocation10 + $0x160] sm:$0xff] }
  0xdf   : > { %1330 = vmatprep.subr.bf16.mxu0 %v1329_v31  ;;  %1362 = vmatprep.subr.bf16.mxu1 %v1361_v34  ;;  %v509_v58 = vld [vmem:[#allocation10 + $0x168] sm:$0xff]  ;;  %v1339_v59 = vpack.c.bf16 %v475_v53, %v474_v52  ;;  %v1341_v60 = vpack.c.bf16 %v493_v56, %v492_v55  ;;  %v476_v61 = vld [vmem:[#allocation10 + $0x60] sm:$0xff]  ;;  %v494_v0 = vld [vmem:[#allocation10 + $0xf0] sm:$0xff] }
  0xe0   : > { %1273 = vmatprep.mubr.f32.mxu1 %v454_v50  ;;  %v477_v62 = vld [vmem:[#allocation10 + $0x68] sm:$0xff]  ;;  %v1373_v63 = vpack.c.bf16 %v509_v58, %v508_v57  ;;  %v495_v1 = vld [vmem:[#allocation10 + $0xf8] sm:$0xff]  ;;  %v510_v2 = vld [vmem:[#allocation10 + $0x170] sm:$0xff] }
  0xe1   : > { %v511_v3 = vld [vmem:[#allocation10 + $0x178] sm:$0xff]  ;;  %v1343_v4 = vpack.c.bf16 %v477_v62, %v476_v61  ;;  %v1345_v5 = vpack.c.bf16 %v495_v1, %v494_v0  ;;  %v478_v6 = vld [vmem:[#allocation10 + $0x70] sm:$0xff]  ;;  %v791_v9 = vld [vmem:[#allocation11 + $0x80] sm:$0xff] }
  0xe2   : > { %1332 = vmatpush3.bf16.msra.mxu0 %v1331_v39  ;;  %1364 = vmatpush3.bf16.msra.mxu1 %v1361_v34  ;;  %v479_v7 = vld [vmem:[#allocation10 + $0x78] sm:$0xff]  ;;  %v1377_v8 = vpack.c.bf16 %v511_v3, %v510_v2  ;;  %v792_v10 = vld [vmem:[#allocation11 + $0x88] sm:$0xff]  ;;  %v436_v11 = vld [vmem:[#allocation8] sm:$0xff] }
  0xe3   : > { %1334 = vmatprep.subr.bf16.mxu0 %v1333_v40  ;;  %1366 = vmatprep.subr.bf16.mxu1 %v1365_v43  ;;  %v437_v12 = vld [vmem:[#allocation8 + $0x8] sm:$0xff]  ;;  %v1347_v13 = vpack.c.bf16 %v479_v7, %v478_v6  ;;  %v1413_v14 = vpack.c.bf16 %v792_v10, %v791_v9  ;;  %v775_v15 = vld [vmem:[#allocation11] sm:$0xff]  ;;  %v793_v18 = vld [vmem:[#allocation11 + $0x90] sm:$0xff] }
  0xe4   : > { %v776_v16 = vld [vmem:[#allocation11 + $0x8] sm:$0xff]  ;;  %v1381_v17 = vpack.c.bf16 %v437_v12, %v436_v11  ;;  %v794_v19 = vld [vmem:[#allocation11 + $0x98] sm:$0xff]  ;;  %v438_v20 = vld [vmem:[#allocation8 + $0x10] sm:$0xff] }
  0xe5   : > { %v439_v21 = vld [vmem:[#allocation8 + $0x18] sm:$0xff]  ;;  %v452_v22 = vld [vmem:[%s2199_s3] sm:$0xff]  ;;  %v1415_v23 = vpack.c.bf16 %v776_v16, %v775_v15  ;;  %v457_v24 = vld [vmem:[%s2199_s3 + $0x28] sm:$0xff]  ;;  %v1417_v25 = vpack.c.bf16 %v794_v19, %v793_v18 }
  0xe6   : > { %1336 = vmatpush3.bf16.msra.mxu0 %v1335_v48  ;;  %1368 = vmatpush3.bf16.msra.mxu1 %v1365_v43  ;;  %v777_v26 = vld [vmem:[#allocation11 + $0x10] sm:$0xff]  ;;  %v778_v27 = vld [vmem:[#allocation11 + $0x18] sm:$0xff]  ;;  %v1385_v28 = vpack.c.bf16 %v439_v21, %v438_v20  ;;  %v795_v29 = vld [vmem:[#allocation11 + $0xa0] sm:$0xff] }
  0xe7   : > { %1338 = vmatprep.subr.bf16.mxu0 %v1337_v51  ;;  %1370 = vmatprep.subr.bf16.mxu1 %v1369_v54  ;;  %v796_v30 = vld [vmem:[#allocation11 + $0xa8] sm:$0xff]  ;;  %v440_v31 = vld [vmem:[#allocation8 + $0x20] sm:$0xff]  ;;  %v1419_v34 = vpack.c.bf16 %v778_v27, %v777_v26  ;;  %v455_v35 = vld [vmem:[%s2199_s3 + $0x18] sm:$0xff] }
  0xe8   : > { %v441_v32 = vld [vmem:[#allocation8 + $0x28] sm:$0xff]  ;;  %v456_v33 = vld [vmem:[%s2199_s3 + $0x20] sm:$0xff]  ;;  %v1421_v37 = vpack.c.bf16 %v796_v30, %v795_v29  ;;  %v459_v40 = vld [vmem:[%s2199_s3 + $0x38] sm:$0xff] }
  0xe9   : > { %v460_v36 = vld [vmem:[%s2199_s3 + $0x40] sm:$0xff]  ;;  %v780_v39 = vld [vmem:[#allocation11 + $0x28] sm:$0xff]  ;;  %v1389_v41 = vpack.c.bf16 %v441_v32, %v440_v31  ;;  %v797_v42 = vld [vmem:[#allocation11 + $0xb0] sm:$0xff] }
  0xea   : > { %1340 = vmatpush3.bf16.msra.mxu0 %v1339_v59  ;;  %1372 = vmatpush3.bf16.msra.mxu1 %v1369_v54  ;;  %v779_v38 = vld [vmem:[#allocation11 + $0x20] sm:$0xff]  ;;  %v798_v43 = vld [vmem:[#allocation11 + $0xb8] sm:$0xff]  ;;  %v442_v44 = vld [vmem:[#allocation8 + $0x30] sm:$0xff] }
  0xeb   : > { %1342 = vmatprep.subr.bf16.mxu0 %v1341_v60  ;;  %1374 = vmatprep.subr.bf16.mxu1 %v1373_v63  ;;  %v443_v45 = vld [vmem:[#allocation8 + $0x38] sm:$0xff]  ;;  %v1423_v47 = vpack.c.bf16 %v780_v39, %v779_v38  ;;  %v458_v48 = vld [vmem:[%s2199_s3 + $0x30] sm:$0xff]  ;;  %v432_v49 = vld [vmem:[%s2191_s23] sm:$0xff]  ;;  %v1425_v50 = vpack.c.bf16 %v798_v43, %v797_v42 }
  0xec   : > { %v463_v46 = vld [vmem:[%s2199_s3 + $0x58] sm:$0xff]  ;;  %v781_v51 = vld [vmem:[#allocation11 + $0x30] sm:$0xff]  ;;  %v1393_v54 = vpack.c.bf16 %v443_v45, %v442_v44  ;;  %v799_v55 = vld [vmem:[#allocation11 + $0xc0] sm:$0xff] }
  0xed   : > { %v782_v52 = vld [vmem:[#allocation11 + $0x38] sm:$0xff]  ;;  %v462_v53 = vld [vmem:[%s2199_s3 + $0x50] sm:$0xff]  ;;  %v800_v56 = vld [vmem:[#allocation11 + $0xc8] sm:$0xff] }
  0xee   : > { %1344 = vmatpush3.bf16.msra.mxu0 %v1343_v4  ;;  %1376 = vmatpush3.bf16.msra.mxu1 %v1373_v63  ;;  %v444_v57 = vld [vmem:[#allocation8 + $0x40] sm:$0xff]  ;;  %v445_v58 = vld [vmem:[#allocation8 + $0x48] sm:$0xff]  ;;  %v1427_v59 = vpack.c.bf16 %v782_v52, %v781_v51  ;;  %v1429_v61 = vpack.c.bf16 %v800_v56, %v799_v55  ;;  %v801_v2 = vld [vmem:[#allocation11 + $0xd0] sm:$0xff] }
  0xef   : > { %1346 = vmatprep.subr.bf16.mxu0 %v1345_v5  ;;  %1378 = vmatprep.subr.bf16.mxu1 %v1377_v8  ;;  %v461_v60 = vld [vmem:[%s2199_s3 + $0x48] sm:$0xff]  ;;  %v783_v62 = vld [vmem:[#allocation11 + $0x40] sm:$0xff]  ;;  %v1397_v1 = vpack.c.bf16 %v445_v58, %v444_v57  ;;  %v802_v3 = vld [vmem:[#allocation11 + $0xd8] sm:$0xff] }
  0xf0   : > { %v784_v63 = vld [vmem:[#allocation11 + $0x48] sm:$0xff]  ;;  %v446_v4 = vld [vmem:[#allocation8 + $0x50] sm:$0xff]  ;;  %v447_v5 = vld [vmem:[#allocation8 + $0x58] sm:$0xff]  ;;  %v1433_v7 = vpack.c.bf16 %v802_v3, %v801_v2 }
  0xf1   : > { %v768_v0 = vld [vmem:[%s2206_s11 + $0x8] sm:$0xff]  ;;  %v1431_v6 = vpack.c.bf16 %v784_v63, %v783_v62  ;;  %v786_v9 = vld [vmem:[#allocation11 + $0x58] sm:$0xff]  ;;  %v1401_v10 = vpack.c.bf16 %v447_v5, %v446_v4  ;;  %v803_v11 = vld [vmem:[#allocation11 + $0xe0] sm:$0xff] }
  0xf2   : > { %1348 = vmatpush3.bf16.msra.mxu0 %v1347_v13  ;;  %1380 = vmatpush3.bf16.msra.mxu1 %v1377_v8  ;;  %v785_v8 = vld [vmem:[#allocation11 + $0x50] sm:$0xff]  ;;  %v804_v12 = vld [vmem:[#allocation11 + $0xe8] sm:$0xff]  ;;  %v448_v13 = vld [vmem:[#allocation8 + $0x60] sm:$0xff] }
  0xf3   : > { %1414 = vmatprep.subr.bf16.mxu0 %v1413_v14  ;;  %1382 = vmatprep.subr.bf16.mxu1 %v1381_v17  ;;  %v449_v14 = vld [vmem:[#allocation8 + $0x68] sm:$0xff]  ;;  %v1435_v15 = vpack.c.bf16 %v786_v9, %v785_v8  ;;  %v1437_v16 = vpack.c.bf16 %v804_v12, %v803_v11  ;;  %v805_v20 = vld [vmem:[#allocation11 + $0xf0] sm:$0xff]  ;;  %v806_v21 = vld [vmem:[#allocation11 + $0xf8] sm:$0xff] }
  0xf4   : > { %v788_v18 = vld [vmem:[#allocation11 + $0x68] sm:$0xff]  ;;  %v1405_v19 = vpack.c.bf16 %v449_v14, %v448_v13  ;;  %v789_v26 = vld [vmem:[#allocation11 + $0x70] sm:$0xff]  ;;  %v790_v27 = vld [vmem:[#allocation11 + $0x78] sm:$0xff] }
  0xf5   : > { %577 = vmatmul.mubr.f32.vlgmr.msra.gmra.mrb[0].mxu0 %v452_v22  ;;  %1274 = vmatmul.mubr.f32.vlgmr.msra.gmra.mrb[0].mxu1 %v457_v24  ;;  %v450_v22 = vld [vmem:[#allocation8 + $0x70] sm:$0xff]  ;;  %v1443_v29 = vpack.c.bf16 %v790_v27, %v789_v26  ;;  %v767_v30 = vld [vmem:[%s2206_s11] sm:$0xff]  ;;  %v433_v31 = vld [vmem:[%s2191_s23 + $0x8] sm:$0xff] }
  0xf6   : > { %1416 = vmatpush3.bf16.msra.mxu0 %v1415_v23  ;;  %1384 = vmatpush3.bf16.msra.mxu1 %v1381_v17  ;;  %v787_v17 = vld [vmem:[#allocation11 + $0x60] sm:$0xff]  ;;  %v451_v23 = vld [vmem:[#allocation8 + $0x78] sm:$0xff]  ;;  %v773_v39 = vld [vmem:[%s2206_s11 + $0x30] sm:$0xff] }
  0xf7   : > { %1418 = vmatprep.subr.bf16.mxu0 %v1417_v25  ;;  %1386 = vmatprep.subr.bf16.mxu1 %v1385_v28  ;;  %v1439_v24 = vpack.c.bf16 %v788_v18, %v787_v17  ;;  %v1441_v25 = vpack.c.bf16 %v806_v21, %v805_v20  ;;  %v770_v32 = vld [vmem:[%s2206_s11 + $0x18] sm:$0xff] }
  0xf8   : > { %581 = vmatprep.mubr.f32.mxu0 %v456_v33  ;;  %1276 = vmatprep.mubr.f32.mxu1 %v460_v36  ;;  %v434_v33 = vld [vmem:[%s2191_s23 + $0x10] sm:$0xff]  ;;  %v772_v36 = vld [vmem:[%s2206_s11 + $0x28] sm:$0xff]  ;;  %v774_v38 = vld [vmem:[%s2206_s11 + $0x38] sm:$0xff] }
  0xf9   : > { %582 = vmatmul.mubr.f32.gmra.mrb[2].mxu0 %v455_v35  ;;  %1277 = vmatmul.mubr.f32.gmra.mrb[2].mxu1 %v463_v46  ;;  %v435_v35 = vld [vmem:[%s2191_s23 + $0x18] sm:$0xff] }
  0xfa   : > { %1420 = vmatpush3.bf16.msra.mxu0 %v1419_v34  ;;  %586 = vmatprep.mubr.f32.mxu0 %v459_v40  ;;  %v769_v34 = vld [vmem:[%s2206_s11 + $0x10] sm:$0xff] }
  0xfb   : > { %1388 = vmatpush3.bf16.msra.mxu1 %v1385_v28  ;;  %1422 = vmatprep.subr.bf16.mxu0 %v1421_v37  ;;  %v1409_v28 = vpack.c.bf16 %v451_v23, %v450_v22  ;;  %v771_v37 = vld [vmem:[%s2206_s11 + $0x20] sm:$0xff] }
  0xfc   : > { %1390 = vmatprep.subr.bf16.mxu1 %v1389_v41  ;;  %1311 = vmatprep.mubr.f32.mxu1 %v432_v49 }
  0xfd   : > { %587 = vmatmul.mubr.f32.gmra.mrb[4].mxu0 %v458_v48 }
  0xfe   : > { %1424 = vmatpush3.bf16.msra.mxu0 %v1423_v47  ;;  %591 = vmatprep.mubr.f32.mxu0 %v462_v53 }
  0xff   : > { %1392 = vmatpush3.bf16.msra.mxu1 %v1389_v41  ;;  %1426 = vmatprep.subr.bf16.mxu0 %v1425_v50 }
 0x100   : > { %1394 = vmatprep.subr.bf16.mxu1 %v1393_v54 }
 0x101   : > { %592 = vmatmul.mubr.f32.gmra.mrb[6].mxu0 %v461_v60 }
 0x102   : > { %1428 = vmatpush3.bf16.msra.mxu0 %v1427_v59  ;;  %871 = vmatprep.mubr.f32.mxu0 %v768_v0 }
 0x103   : > { %1396 = vmatpush3.bf16.msra.mxu1 %v1393_v54  ;;  %1430 = vmatprep.subr.bf16.mxu0 %v1429_v61 }
 0x104   : > { %1398 = vmatprep.subr.bf16.mxu1 %v1397_v1 }
 0x106   : > { %1432 = vmatpush3.bf16.msra.mxu0 %v1431_v6 }
 0x107   : > { %1400 = vmatpush3.bf16.msra.mxu1 %v1397_v1  ;;  %1434 = vmatprep.subr.bf16.mxu0 %v1433_v7 }
 0x108   : > { %1402 = vmatprep.subr.bf16.mxu1 %v1401_v10 }
 0x10a   : > { %1436 = vmatpush3.bf16.msra.mxu0 %v1435_v15 }
 0x10b   : > { %1404 = vmatpush3.bf16.msra.mxu1 %v1401_v10  ;;  %1438 = vmatprep.subr.bf16.mxu0 %v1437_v16 }
 0x10c   : > { %1406 = vmatprep.subr.bf16.mxu1 %v1405_v19 }
 0x10e   : > { %1440 = vmatpush3.bf16.msra.mxu0 %v1439_v24 }
 0x10f   : > { %1408 = vmatpush3.bf16.msra.mxu1 %v1405_v19  ;;  %1442 = vmatprep.subr.bf16.mxu0 %v1441_v25 }
 0x110   : > { %1410 = vmatprep.subr.bf16.mxu1 %v1409_v28 }
 0x112   : > { %1444 = vmatpush3.bf16.msra.mxu0 %v1443_v29 }
 0x113   : > { %1412 = vmatpush3.bf16.msra.mxu1 %v1409_v28 }
 0x115   : > { %872 = vmatmul.mubr.f32.vlgmr.msra.gmra.mrb[8].mxu0 %v767_v30 }
 0x116   : > { %1312 = vmatmul.mubr.f32.vlgmr.msra.gmra.mrb[0].mxu1 %v433_v31  ;;  %876 = vmatprep.mubr.f32.mxu0 %v770_v32 }
 0x117   : > { %1314 = vmatprep.mubr.f32.mxu1 %v434_v33 }
 0x119   : > { %877 = vmatmul.mubr.f32.gmra.mrb[10].mxu0 %v769_v34 }
 0x11a   : > { %1315 = vmatmul.mubr.f32.gmra.mrb[2].mxu1 %v435_v35  ;;  %881 = vmatprep.mubr.f32.mxu0 %v772_v36 }
 0x11d   : > { %882 = vmatmul.mubr.f32.gmra.mrb[12].mxu0 %v771_v37 }
 0x11e   : > { %886 = vmatprep.mubr.f32.mxu0 %v774_v38 }
 0x121   : > { %887 = vmatmul.mubr.f32.gmra.mrb[14].mxu0 %v773_v39 }
 0x1c8   : > { %v1145_v40 = vpop.f32.mrb[0].mxu0 }
 0x1c9   : > { %v1146_v41 = vpop.f32.mrb[1].mxu0 }
 0x1ca   : > { %v1147_v42 = vadd.f32 %v1146_v41, %v1145_v40 }
 0x1cc   : > { %v1148_v43 = vpop.f32.mrb[2].mxu0 }
 0x1cd   : > { %v1149_v44 = vpop.f32.mrb[3].mxu0 }
 0x1ce   : > { %v1150_v45 = vadd.f32 %v1149_v44, %v1148_v43 }
 0x1d0   : > { %v1151_v46 = vpop.f32.mrb[4].mxu0 }
 0x1d1   : > { %v1152_v47 = vpop.f32.mrb[5].mxu0 }
 0x1d2   : > { %v1153_v48 = vadd.f32 %v1152_v47, %v1151_v46 }
 0x1d4   : > { %v1154_v49 = vpop.f32.mrb[6].mxu0 }
 0x1d5   : > { %v1155_v50 = vpop.f32.mrb[7].mxu0 }
 0x1d6   : > { %v1156_v51 = vadd.f32 %v1155_v50, %v1154_v49 }
 0x1e8   : > { %v1229_v52 = vpop.f32.mrb[8].mxu0 }
 0x1e9   : > { %v1313_v53 = vpop.f32.mrb[0].mxu1  ;;  %v1230_v54 = vpop.f32.mrb[9].mxu0 }
 0x1ea   : > { %v1445_v55 = vadd.f32 %v1313_v53, %v1150_v45  ;;  %v748_v56 = vpop.f32.mrb[1].mxu1  ;;  %v1231_v57 = vadd.f32 %v1230_v54, %v1229_v52 }
 0x1eb   : > { %v1446_v58 = vadd.f32 %v1147_v42, %v748_v56 }
 0x1ec   : > { %v1232_v59 = vpop.f32.mrb[10].mxu0 }
 0x1ed   : > { %v892_v60 = vadd.f32 %v1446_v58, %v1231_v57  ;;  %v1316_v61 = vpop.f32.mrb[2].mxu1  ;;  %v1233_v62 = vpop.f32.mrb[11].mxu0 }
 0x1ee   : > { %v1447_v63 = vadd.f32 %v1316_v61, %v1156_v51  ;;  %v758_v0 = vpop.f32.mrb[3].mxu1  ;;  %v1234_v1 = vadd.f32 %v1233_v62, %v1232_v59 }
 0x1ef   : > { %v896_v2 = vmax.f32 %v892_v60, 0.0  ;;  %v1448_v3 = vadd.f32 %v1153_v48, %v758_v0 }
 0x1f0   : > { %v893_v4 = vadd.f32 %v1445_v55, %v1234_v1  ;;  %v1235_v5 = vpop.f32.mrb[12].mxu0 }
 0x1f1   : > { %900 = vst [vmem:[%s427_s27] sm:$0xff] %v896_v2  ;;  %v1236_v6 = vpop.f32.mrb[13].mxu0 }
 0x1f2   : > { %v897_v7 = vmax.f32 %v893_v4, 0.0  ;;  %v1237_v8 = vadd.f32 %v1236_v6, %v1235_v5 }
 0x1f4   : > { %901 = vst [vmem:[%s427_s27 + $0x8] sm:$0xff] %v897_v7  ;;  %v894_v9 = vadd.f32 %v1448_v3, %v1237_v8  ;;  %v1238_v10 = vpop.f32.mrb[14].mxu0 }
 0x1f5   : > { %v1239_v11 = vpop.f32.mrb[15].mxu0 }
 0x1f6   : > { %v898_v12 = vmax.f32 %v894_v9, 0.0  ;;  %v1240_v13 = vadd.f32 %v1239_v11, %v1238_v10 }
 0x1f8   : > { %902 = vst [vmem:[%s427_s27 + $0x10] sm:$0xff] %v898_v12  ;;  %v895_v14 = vadd.f32 %v1447_v63, %v1240_v13 }
 0x1fa   : > { %v899_v15 = vmax.f32 %v895_v14, 0.0 }
 0x1fc   : > { %903 = vst [vmem:[%s427_s27 + $0x18] sm:$0xff] %v899_v15 }
 0x1fd   : > { %1754 = shalt.err (!%p1751_p5)
}
 0x1fe   : > { %s1755_s16 = scalar_lea.hbm %s2248_s15, 512  ;;  %s1759_s23 = scalar_lea.hbm %s2360_s12, 1024 }
 0x1ff   : > { %p1756_p9 = scmp.ne.s32.totalorder %s2248_s15, %s1755_s16  ;;  %p1760_p12 = scmp.lt.u32.totalorder %s2248_s15, %s2360_s12 }
 0x200   : > { %p1761_p1 = scmp.lt.u32.totalorder %s1759_s23, %s1755_s16  ;;  %p1763_p0 = scmp.lt.u32.totalorder %s1755_s16, %s2248_s15 }
 0x201   : > { %p1757_p3 = pnand %p1756_p9, %p2361_p10 }
 0x202   : > { %p1762_p4 = por %p1761_p1, %p1760_p12 }
 0x203   : > { %p1758_p7 = pneg %p1757_p3 }
 0x204   : > { %p1764_p2 = por %p1763_p0, %p1762_p4 }
 0x206   : > { %p1765_p13 = pnand %p1764_p2, %p1758_p7 }
 0x208   : > { %1768 = shalt.err (!%p1765_p13)
}
 0x209   : > { %s1850_s20 = smov 128   ;;  %s1851_s3 = smov 8  }
 0x20a   : > { %1474 = dma.vmem_to_hbm [thread:$0]  (%p2361_p10), %s2243_s8, 512, %s2248_s15, %s905_s18, %s1850_s20, %s1850_s20, %s1851_s3  }
 0x20b PF: > { %s2362_s30 = sld [smem:[#allocation19_spill]]  ;;  %s2363_s11 = sld [smem:[#allocation22_spill]] }
 0x20c   : > { %p2365_p11 = scmp.ge.s32.totalorder %s1835_s26, 2 }
 0x211   : > { %s934_s27 = sand.u32 1, %s2362_s30   ;;  %p2364_p6 = scmp.ne.s32.totalorder %s2363_s11, 0 }
 0x212   : > { %s935_s14 = scalar_lea.sflag [#allocation4], %s934_s27 }
 0x213   : > { %p1497_p8 = pnand %p2365_p11, %p2364_p6 }
 0x215   : > { %1810 = dma.done.wait (!%p1497_p8), %s935_s14, 512  }
 0x216   : > { %1812 = vsyncadd (!%p1497_p8), %s935_s14, 4294966784  ;;  %s27_s26 = sadd.s32 1, %s1835_s26   ;;  %s2366_s19 = sld [smem:[#allocation20_spill]] }
 0x217   : > { %p24_p5 = scmp.ge.s32.totalorder %s27_s26, 4   ;;  %s2367_s23 = sld [smem:[#allocation24_spill]] }
 0x218   : > { %s2368_s6 = sld [smem:[#allocation23_spill]]  ;;  %s2369_s21 = smov %s1819_s22 }
 0x219   : > { %s2371_s24 = smov %s1831_s25  ;;  %26 = sbr.rel (!%p24_p5) target bundleno = 14 (0xe), region = 128 }
 0x21c   : > { %s2370_s22 = smov %s2366_s19 }
 0x21e   : > { %s2372_s25 = smov %s2368_s6 }
 0x220   :  { %940 = vsyncpa [#allocation3], 1 }
 0x221   :  { %942 = vsyncpa [#allocation3 + $0x1], 1 }
 0x222   :  { %943 = vsyncpa [#allocation6], 1 }
 0x223   :  { %945 = vsyncpa [#allocation6 + $0x1], 1 }
 0x224   :  { %946 = vsyncpa [#allocation9], 1 }
 0x225   :  { %947 = vsyncpa [#allocation12], 1 }
 0x226   :  { %948 = vsyncpa [#allocation4], 1 }
 0x227   :  { %950 = vsyncpa [#allocation4 + $0x1], 1 }

// kernel: tpu_custom_call.1
= control target key start
LH: loop header
LB: loop body
LE: loop exit
PB: predicated region body
PF: predicated region fallthrough
CT: control target
= control target key end

     0   :  { %s2297_s0 = inlined_call_operand.hbm [shape: f32[64,128], index: 0, kind: input, shape index: {}]   ;;  %s2298_s1 = inlined_call_operand.hbm [shape: f32[64,384], index: 1, kind: input, shape index: {}]   ;;  %s2299_s2 = inlined_call_operand.hbm [shape: f32[64,256], index: 2, kind: input, shape index: {}]   ;;  %s2300_s3 = inlined_call_operand.hbm [shape: f32[128,128], index: 3, kind: input, shape index: {}]   ;;  %s2301_s4 = inlined_call_operand.hbm [shape: f32[384,128], index: 4, kind: input, shape index: {}]   ;;  %s2302_s5 = inlined_call_operand.hbm [shape: f32[256,128], index: 5, kind: input, shape index: {}]   ;;  %s2303_s6 = inlined_call_operand.hbm [shape: f32[64,128], index: 6, kind: output, shape index: {}]  }
   0x1   :  { %2325 = sst [smem:[#allocation25_spill]] %s2298_s1 }
   0x2   :  { %2326 = sst [smem:[#allocation26_spill]] %s2300_s3 }
   0x3   :  { %2327 = sst [smem:[#allocation27_spill]] %s2303_s6 }
   0x4   :  { %11 = vsyncpa [#allocation3], 0 }
   0x5   :  { %13 = vsyncpa [#allocation3 + $0x1], 0 }
   0x6   :  { %14 = vsyncpa [#allocation6], 0 }
   0x7   :  { %16 = vsyncpa [#allocation6 + $0x1], 0 }
   0x8   :  { %17 = vsyncpa [#allocation9], 0 }
   0x9   :  { %18 = vsyncpa [#allocation12], 0 }
   0xa   :  { %19 = vsyncpa [#allocation4], 0 }
   0xb   :  { %21 = vsyncpa [#allocation4 + $0x1], 0  ;;  %s1887_s21 = smov 0   ;;  %s1889_s22 = smov 0  }
   0xc   :  { %s1891_s23 = smov 0   ;;  %s1893_s24 = smov 0  }
   0xd   :  { %s1895_s25 = smov 0   ;;  %s1897_s26 = smov 0  }
   0xe LB: > { %2328 = sst [smem:[#allocation19_spill]] %s1815_s21  ;;  %s1918_s27 = sadd.s32 4294967295, %s1835_s26   ;;  %s1835_s26 = sphi %s1897_s26, %s27_s26   ;;  %s1831_s25 = sphi %s1895_s25, %s2372_s25   ;;  %s1827_s24 = sphi %s1893_s24, %s2371_s24   ;;  %s1823_s23 = sphi %s1891_s23, %s2367_s23   ;;  %s1819_s22 = sphi %s1889_s22, %s2370_s22   ;;  %s1815_s21 = sphi %s1887_s21, %s2369_s21  }
   0xf   : > { %2329 = sst [smem:[#allocation20_spill]] %s1823_s23  ;;  %s1081_s28 = sadd.s32 4294967294, %s1835_s26  }
  0x10   : > { %p53_p0 = scmp.ne.s32.totalorder %s1823_s23, %s1819_s22  ;;  %p54_p1 = scmp.eq.s32.totalorder %s1835_s26, 0 }
  0x11   : > { %p59_p2 = scmp.ne.s32.totalorder %s1819_s22, %s1815_s21  ;;  %p2305_p3 = scmp.eq.s32.totalorder %s1918_s27, 0 }
  0x12   : > { %p215_p4 = scmp.eq.s32.totalorder %s1918_s27, 1  ;;  %p1929_p5 = por %p54_p1, %p53_p0 }
  0x13   : > { %p221_p6 = scmp.eq.s32.totalorder %s1081_s28, 1  ;;  %p1935_p7 = por %p2305_p3, %p59_p2 }
  0x14   : > { %p1939_p8 = por %p215_p4, %p53_p0  ;;  %p1082_p10 = scmp.ge.s32.totalorder %s1835_s26, 1 }
  0x15   : > { %s2331_s7 = scalar_select %p1935_p7, 1, 0 }
  0x16   : > { %s2332_s8 = scalar_select %p1939_p8, 1, 0 }
  0x17   : > { %p1943_p9 = por %p221_p6, %p59_p2  ;;  %p228_p11 = scmp.lt.s32.totalorder %s1835_s26, 3 }
  0x18   : > { %2333 = sst [smem:[#allocation21_spill]] %s2332_s8  ;;  %s1837_s11 = smov [#allocation8]  }
  0x19   : > { %s2334_s9 = scalar_select %p1943_p9, 1, 0 }
  0x1a   : > { %p1949_p12 = pnand %p1082_p10, %p228_p11  ;;  %s242_s12 = sshll.u32 %s1837_s11, 4  ;;  %s1953_s12 = int_to_ptr.vmem [resolvable:$true] %s242_s12 }
  0x1b   : > { %2335 = sst [smem:[#allocation22_spill]] %s2334_s9  ;;  %s39_s14 = sadd.s32 1, %s1831_s25 }
  0x1c   : > { %s2336_s10 = scalar_select %p1949_p12, 1, 0 }
  0x1d   : > { %p1476_p13 = pneg %p1949_p12  ;;  %s1967_s15 = sand.u32 1, %s1823_s23  }
  0x1e   : > { %p1969_p4 = scmp.ge.s32.totalorder %s39_s14, 2  ;;  %s2339_s3 = sld [smem:[#allocation26_spill]] }
  0x1f   : > { %p1961_p2 = pnand %p1476_p13, %p2305_p3 }
  0x21   : > { %s2337_s13 = scalar_select %p1961_p2, 1, 0 }
  0x22   : > { %p1981_p10 = pneg %p1961_p2 }
  0x24   : > { %s1567_s19 = scalar_lea.hbm %s2339_s3, 2048 }
  0x25   : > { %p1568_p6 = scmp.ne.s32.totalorder %s2339_s3, %s1567_s19  ;;  %p1574_p0 = scmp.lt.u32.totalorder %s1567_s19, %s2339_s3 }
  0x26   : > { %s2340_s11 = scalar_select %p1981_p10, 1, 0 }
  0x27   : > { %p1570_p11 = pnand %p1981_p10, %p1568_p6 }
  0x29   : > { %p1571_p13 = pneg %p1570_p11 }
  0x2b   : > { %p1576_p3 = pnand %p1574_p0, %p1571_p13 }
  0x2d   : > { %1579 = shalt.err (!%p1576_p3)
}
  0x2e   : > { %s1580_s17 = scalar_lea.vmem %s1953_s12, 2048  ;;  %p1588_p7 = scmp.lt.s32.totalorder %s1953_s12, %s1953_s12 }
  0x2f   : > { %p1581_p1 = scmp.ne.s32.totalorder %s1953_s12, %s1580_s17  ;;  %p1589_p12 = scmp.lt.s32.totalorder %s1580_s17, %s1580_s17 }
  0x31   : > { %p1583_p9 = pnand %p1581_p1, %p1981_p10  ;;  %p1590_p6 = por %p1589_p12, %p1588_p7 }
  0x33   : > { %p1584_p8 = pneg %p1583_p9 }
  0x35   : > { %p1591_p11 = pnand %p1590_p6, %p1584_p8 }
  0x37   : > { %1594 = shalt.err (!%p1591_p11)
}
  0x38   : > { %s2313_s18 = smov 128   ;;  %s2315_s29 = smov 8  }
  0x39   : > { %1479 = dma.hbm_to_vmem [thread:$0]  (!%p1961_p2), %s2339_s3, 2048, %s1953_s12, [#allocation9], %s2313_s18, %s2313_s18, %s2315_s29  }
  0x3a   : > { %s2374_s14 = smov (%p1969_p4, %s39_s14), 0  ;;  %p2342_p3 = scmp.lt.s32.totalorder %s1835_s26, 2 }
  0x3b   : > { %2341 = sst [smem:[#allocation23_spill]] %s2374_s14  ;;  %s307_s28 = sand.u32 1, %s1835_s26  }
  0x3c   : > { %p2013_p7 = pnand %p2342_p3, %p1929_p5  ;;  %s43_s17 = ssub.s32 %s1831_s25, %s2374_s14 }
  0x3d   : > { %p44_p8 = scmp.eq.s32.totalorder %s43_s17, 0  ;;  %s1453_s21 = smul.u32 96, %s1967_s15 }
  0x3e   : > { %s2343_s20 = scalar_select %p2013_p7, 1, 0 }
  0x3f   : > { %s2344_s6 = sadd.s32 1, %s1823_s23  ;;  %s1454_s9 = smul.u32 1536, %s1831_s25 }
  0x40   : > { %s2024_s8 = scalar_select %p44_p8, %s1823_s23, %s2344_s6  }
  0x41   : > { %s311_s12 = scalar_lea.vmem [#allocation5], %s1453_s21  ;;  %s2346_s1 = sld [smem:[#allocation25_spill]] }
  0x42   : > { %2345 = sst [smem:[#allocation24_spill]] %s2024_s8  ;;  %s319_s16 = sshll.u32 %s311_s12, 4  ;;  %s2032_s16 = int_to_ptr.vmem [resolvable:$true] %s319_s16 }
  0x43   : > { %s2034_s29 = scalar_lea.sflag [#allocation6], %s307_s28  ;;  %p2040_p9 = pneg %p2013_p7 }
  0x47   : > { %s2030_s30 = scalar_lea.hbm %s2346_s1, %s1454_s9  ;;  %s1600_s9 = scalar_lea.hbm %s2346_s1, 3072 }
  0x48   : > { %s1595_s17 = scalar_lea.hbm %s2030_s30, 1536  ;;  %p1601_p1 = scmp.lt.u32.totalorder %s2030_s30, %s2346_s1 }
  0x49   : > { %p1596_p5 = scmp.ne.s32.totalorder %s2030_s30, %s1595_s17  ;;  %p1602_p4 = scmp.lt.u32.totalorder %s1600_s9, %s1595_s17 }
  0x4a   : > { %p1604_p6 = scmp.lt.u32.totalorder %s1595_s17, %s2030_s30 }
  0x4b   : > { %p1598_p12 = pnand %p2040_p9, %p1596_p5  ;;  %p1603_p13 = por %p1602_p4, %p1601_p1 }
  0x4d   : > { %p1599_p0 = pneg %p1598_p12  ;;  %p1605_p11 = por %p1604_p6, %p1603_p13 }
  0x4f   : > { %p1606_p3 = pnand %p1605_p11, %p1599_p0 }
  0x51   : > { %1609 = shalt.err (!%p1606_p3)
}
  0x52   : > { %s1610_s28 = scalar_lea.vmem %s2032_s16, 1536  ;;  %s1840_s21 = smov [#allocation5]  }
  0x53   : > { %p1611_p8 = scmp.ne.s32.totalorder %s2032_s16, %s1610_s28  ;;  %s1615_s18 = sshll.u32 %s1840_s21, 4  ;;  %s1616_s18 = int_to_ptr.vmem [resolvable:$false] %s1615_s18 }
  0x54   : > { %s1617_s12 = scalar_lea.vmem %s1616_s18, 3072  ;;  %p1618_p2 = scmp.lt.s32.totalorder %s2032_s16, %s1616_s18 }
  0x55   : > { %p1613_p5 = pnand %p1611_p8, %p2040_p9  ;;  %p1619_p10 = scmp.lt.s32.totalorder %s1617_s12, %s1610_s28 }
  0x57   : > { %p1614_p12 = pneg %p1613_p5  ;;  %p1620_p1 = por %p1619_p10, %p1618_p2 }
  0x59   : > { %p1621_p4 = pnand %p1620_p1, %p1614_p12 }
  0x5b   : > { %1624 = shalt.err (!%p1621_p4)
}
  0x5c   : > { %s1841_s17 = smov 384   ;;  %s1842_s9 = smov 24  }
  0x5d   : > { %1492 = dma.hbm_to_vmem [thread:$0]  (!%p2013_p7), %s2030_s30, 1536, %s2032_s16, %s2034_s29, %s1841_s17, %s1841_s17, %s1842_s9  }
  0x5e   : > { %s1843_s19 = smov [#allocation10]   ;;  %s1844_s3 = smov [#allocation11]  }
  0x5f   : > { %s257_s1 = sshll.u32 %s1843_s19, 4  ;;  %s272_s21 = sshll.u32 %s1844_s3, 4  ;;  %s258_s1 = int_to_ptr.vmem [resolvable:$true] %s257_s1  ;;  %s2064_s21 = int_to_ptr.vmem [resolvable:$true] %s272_s21 }
  0x60   : > { %s1625_s12 = scalar_lea.hbm %s2301_s4, 6144  ;;  %p2348_p10 = scmp.ne.s32.totalorder %s2340_s11, 0 }
  0x61   : > { %p1626_p2 = scmp.ne.s32.totalorder %s2301_s4, %s1625_s12  ;;  %p1632_p6 = scmp.lt.u32.totalorder %s1625_s12, %s2301_s4 }
  0x63   : > { %p1628_p0 = pnand %p1626_p2, %p2348_p10 }
  0x65   : > { %p1629_p13 = pneg %p1628_p0 }
  0x67   : > { %p1634_p11 = pnand %p1632_p6, %p1629_p13 }
  0x69   : > { %1637 = shalt.err (!%p1634_p11)
}
  0x6a   : > { %s1638_s3 = scalar_lea.vmem %s258_s1, 6144  ;;  %p1646_p12 = scmp.lt.s32.totalorder %s258_s1, %s258_s1 }
  0x6b   : > { %p1639_p3 = scmp.ne.s32.totalorder %s258_s1, %s1638_s3  ;;  %p1647_p1 = scmp.lt.s32.totalorder %s1638_s3, %s1638_s3 }
  0x6d   : > { %p1641_p8 = pnand %p1639_p3, %p2348_p10  ;;  %p1648_p4 = por %p1647_p1, %p1646_p12 }
  0x6f   : > { %p1642_p5 = pneg %p1641_p8 }
  0x71   : > { %p1649_p7 = pnand %p1648_p4, %p1642_p5 }
  0x73   : > { %1652 = shalt.err (!%p1649_p7)
}
  0x74   : > { %p2349_p2 = scmp.ne.s32.totalorder %s2337_s13, 0  ;;  %s2350_s8 = smov 8  }
  0x75   : > { %s2351_s14 = smov 128   ;;  %s1653_s19 = scalar_lea.hbm %s2302_s5, 4096 }
  0x76   : > { %1482 = dma.hbm_to_vmem [thread:$0]  (!%p2349_p2), %s2301_s4, 6144, %s258_s1, [#allocation9], %s2351_s14, %s2351_s14, %s2350_s8  }
  0x77   : > { %p1654_p0 = scmp.ne.s32.totalorder %s2302_s5, %s1653_s19  ;;  %p1660_p6 = scmp.lt.u32.totalorder %s1653_s19, %s2302_s5 }
  0x79   : > { %p1656_p7 = pnand %p1654_p0, %p2348_p10 }
  0x7b   : > { %p1657_p13 = pneg %p1656_p7 }
  0x7d   : > { %p1662_p11 = pnand %p1660_p6, %p1657_p13 }
  0x7f   : > { %1665 = shalt.err (!%p1662_p11)
}
  0x80   : > { %s1666_s1 = scalar_lea.vmem %s2064_s21, 4096  ;;  %p1674_p12 = scmp.lt.s32.totalorder %s2064_s21, %s2064_s21 }
  0x81   : > { %p1667_p3 = scmp.ne.s32.totalorder %s2064_s21, %s1666_s1  ;;  %p1675_p1 = scmp.lt.s32.totalorder %s1666_s1, %s1666_s1 }
  0x83   : > { %p1669_p8 = pnand %p1667_p3, %p2348_p10  ;;  %p1676_p4 = por %p1675_p1, %p1674_p12 }
  0x85   : > { %p1670_p5 = pneg %p1669_p8 }
  0x87   : > { %p1677_p0 = pnand %p1676_p4, %p1670_p5 }
  0x89   : > { %1680 = shalt.err (!%p1677_p0)
}
  0x8a   : > { %1485 = dma.hbm_to_vmem [thread:$0]  (!%p2349_p2), %s2302_s5, 4096, %s2064_s21, [#allocation12], %s2351_s14, %s2351_s14, %s2350_s8  }
  0x8b   : > { %s1087_s11 = sshll.u32 %s1967_s15, 5  ;;  %s1109_s30 = sshll.u32 %s1831_s25, 9 }
  0x8c   : > { %s2118_s19 = scalar_lea.hbm %s2297_s0, %s1109_s30  ;;  %s290_s13 = scalar_lea.vmem [#allocation2], %s1087_s11 }
  0x8d   : > { %s297_s28 = sshll.u32 %s290_s13, 4  ;;  %s1093_s18 = sshll.u32 %s1967_s15, 6  ;;  %s2120_s28 = int_to_ptr.vmem [resolvable:$true] %s297_s28 }
  0x8e   : > { %s287_s12 = scalar_lea.sflag [#allocation3], %s1967_s15  ;;  %s1681_s16 = scalar_lea.hbm %s2118_s19, 512 }
  0x8f   : > { %p1682_p10 = scmp.ne.s32.totalorder %s2118_s19, %s1681_s16  ;;  %s1686_s3 = scalar_lea.hbm %s2297_s0, 1024 }
  0x90   : > { %p1687_p13 = scmp.lt.u32.totalorder %s2118_s19, %s2297_s0  ;;  %p1688_p6 = scmp.lt.u32.totalorder %s1686_s3, %s1681_s16 }
  0x91   : > { %p1684_p2 = pnand %p1682_p10, %p2040_p9  ;;  %p1690_p3 = scmp.lt.u32.totalorder %s1681_s16, %s2118_s19 }
  0x92   : > { %p1689_p11 = por %p1688_p6, %p1687_p13 }
  0x93   : > { %p1685_p7 = pneg %p1684_p2 }
  0x94   : > { %p1691_p8 = por %p1690_p3, %p1689_p11 }
  0x96   : > { %p1692_p5 = pnand %p1691_p8, %p1685_p7 }
  0x98   : > { %1695 = shalt.err (!%p1692_p5)
}
  0x99   : > { %s1696_s11 = scalar_lea.vmem %s2120_s28, 512  ;;  %s1845_s17 = smov [#allocation2]  }
  0x9a   : > { %p1697_p12 = scmp.ne.s32.totalorder %s2120_s28, %s1696_s11  ;;  %s1701_s9 = sshll.u32 %s1845_s17, 4  ;;  %s1702_s9 = int_to_ptr.vmem [resolvable:$false] %s1701_s9 }
  0x9b   : > { %s1703_s13 = scalar_lea.vmem %s1702_s9, 1024  ;;  %p1704_p0 = scmp.lt.s32.totalorder %s2120_s28, %s1702_s9 }
  0x9c   : > { %p1699_p1 = pnand %p1697_p12, %p2040_p9  ;;  %p1705_p10 = scmp.lt.s32.totalorder %s1703_s13, %s1696_s11 }
  0x9e   : > { %p1700_p4 = pneg %p1699_p1  ;;  %p1706_p2 = por %p1705_p10, %p1704_p0 }
  0xa0   : > { %p1707_p13 = pnand %p1706_p2, %p1700_p4 }
  0xa2   : > { %1710 = shalt.err (!%p1707_p13)
}
  0xa3   : > { %p2352_p7 = scmp.ne.s32.totalorder %s2343_s20, 0  ;;  %s1111_s16 = sshll.u32 %s1831_s25, 10 }
  0xa4   : > { %s2154_s3 = scalar_lea.hbm %s2299_s2, %s1111_s16  ;;  %s333_s23 = scalar_lea.vmem [#allocation7], %s1093_s18 }
  0xa5   : > { %1489 = dma.hbm_to_vmem [thread:$0]  (!%p2352_p7), %s2118_s19, 512, %s2120_s28, %s287_s12, %s2351_s14, %s2351_s14, %s2350_s8  }
  0xa6   : > { %s341_s30 = sshll.u32 %s333_s23, 4  ;;  %s1711_s11 = scalar_lea.hbm %s2154_s3, 1024  ;;  %s2158_s30 = int_to_ptr.vmem [resolvable:$true] %s341_s30 }
  0xa7   : > { %p1712_p6 = scmp.ne.s32.totalorder %s2154_s3, %s1711_s11  ;;  %s1716_s19 = scalar_lea.hbm %s2299_s2, 2048 }
  0xa8   : > { %p1717_p8 = scmp.lt.u32.totalorder %s2154_s3, %s2299_s2  ;;  %p1718_p5 = scmp.lt.u32.totalorder %s1716_s19, %s1711_s11 }
  0xa9   : > { %p1714_p11 = pnand %p1712_p6, %p2040_p9  ;;  %p1720_p1 = scmp.lt.u32.totalorder %s1711_s11, %s2154_s3 }
  0xaa   : > { %p1719_p12 = por %p1718_p5, %p1717_p8 }
  0xab   : > { %p1715_p3 = pneg %p1714_p11 }
  0xac   : > { %p1721_p4 = por %p1720_p1, %p1719_p12 }
  0xae   : > { %p1722_p0 = pnand %p1721_p4, %p1715_p3 }
  0xb0   : > { %1725 = shalt.err (!%p1722_p0)
}
  0xb1   : > { %s1726_s15 = scalar_lea.vmem %s2158_s30, 1024  ;;  %s1846_s18 = smov [#allocation7]  }
  0xb2   : > { %p1727_p10 = scmp.ne.s32.totalorder %s2158_s30, %s1726_s15  ;;  %s1731_s17 = sshll.u32 %s1846_s18, 4  ;;  %s1732_s17 = int_to_ptr.vmem [resolvable:$false] %s1731_s17 }
  0xb3   : > { %s1733_s9 = scalar_lea.vmem %s1732_s17, 2048  ;;  %p1734_p6 = scmp.lt.s32.totalorder %s2158_s30, %s1732_s17 }
  0xb4   : > { %p1729_p2 = pnand %p1727_p10, %p2040_p9  ;;  %p1735_p11 = scmp.lt.s32.totalorder %s1733_s9, %s1726_s15 }
  0xb6   : > { %p1730_p13 = pneg %p1729_p2  ;;  %p1736_p8 = por %p1735_p11, %p1734_p6 }
  0xb8   : > { %p1737_p5 = pnand %p1736_p8, %p1730_p13 }
  0xba   : > { %1740 = shalt.err (!%p1737_p5)
}
  0xbb   : > { %s1847_s13 = smov 256   ;;  %s1848_s16 = smov 16  }
  0xbc   : > { %1495 = dma.hbm_to_vmem [thread:$0]  (!%p2352_p7), %s2154_s3, 1024, %s2158_s30, %s2034_s29, %s1847_s13, %s1847_s13, %s1848_s16  }
  0xbd   : > { %p2353_p9 = scmp.ne.s32.totalorder %s2336_s10, 0 }
  0xbe   : > { %s2185_s6 = sand.u32 (!%p2353_p9), 1, %s1819_s22   ;;  %p2354_p3 = scmp.ne.s32.totalorder (!%p2353_p9), %s2331_s7, 0 }
  0xbf   : > { %353 = sbr.rel (%p2353_p9) target bundleno = 523 (0x20b), region = 44  ;;  %s1098_s21 = sshll.u32 (!%p2353_p9), %s2185_s6, 5 }
  0xc0   : > { %s356_s1 = scalar_lea.sflag (!%p2353_p9), [#allocation3], %s2185_s6  ;;  %s2191_s23 = scalar_lea.vmem (!%p2353_p9), [#allocation2], %s1098_s21 }
  0xc6   : > { %1794 = dma.done.wait (%p2354_p3), %s356_s1, 512  }
  0xc7   : > { %1796 = vsyncadd (%p2354_p3), %s356_s1, 4294966784  ;;  %s364_s10 = sand.u32 1, %s1918_s27   ;;  %s1455_s29 = smul.u32 96, %s2185_s6 }
  0xc8   : > { %s365_s20 = scalar_lea.sflag [#allocation6], %s364_s10 }
  0xc9   : > { %s2199_s3 = scalar_lea.vmem [#allocation5], %s1455_s29 }
  0xca   : > { %1798 = dma.done.wait (%p2354_p3), %s365_s20, 2560  }
  0xcb   : > { %1800 = vsyncadd (%p2354_p3), %s365_s20, 4294964736  ;;  %s1099_s30 = sshll.u32 %s2185_s6, 6  ;;  %p2355_p7 = scmp.eq.s32.totalorder %s1918_s27, 0 }
  0xcc   : > { %s2206_s11 = scalar_lea.vmem [#allocation7], %s1099_s30 }
  0xcd   : > { %1802 = dma.done.wait (%p2355_p7), [#allocation9], 8192   ;;  %p2356_p12 = pmov %p2355_p7 }
  0xce   : > { %p2357_p1 = pmov %p2355_p7 }
  0xcf   : > { %1804 = vsyncadd (%p2356_p12), [#allocation9], 4294959104 }
  0xd0   : > { %1806 = dma.done.wait (%p2357_p1), [#allocation12], 4096   ;;  %p2358_p4 = pmov %p2357_p1 }
  0xd1   : > { %v480_v0 = vld [vmem:[#allocation10 + $0x80] sm:$0xff]  ;;  %v481_v1 = vld [vmem:[#allocation10 + $0x88] sm:$0xff]  ;;  %v482_v9 = vld [vmem:[#allocation10 + $0x90] sm:$0xff]  ;;  %s427_s27 = scalar_lea.vmem [#allocation13], %s1098_s21  ;;  %s2359_s7 = sld [smem:[#allocation21_spill]] }
  0xd2   : > { %1808 = vsyncadd (%p2358_p4), [#allocation12], 4294963200  ;;  %v496_v2 = vld [vmem:[#allocation10 + $0x100] sm:$0xff]  ;;  %v1317_v3 = vpack.c.bf16 %v481_v1, %v480_v0  ;;  %v497_v4 = vld [vmem:[#allocation10 + $0x108] sm:$0xff]  ;;  %s919_s8 = sshll.u32 %s427_s27, 4  ;;  %s1112_s14 = sshll.u32 %s1827_s24, 9  ;;  %s2243_s8 = int_to_ptr.vmem [resolvable:$true] %s919_s8 }
  0xd3   : > { %v464_v5 = vld [vmem:[#allocation10] sm:$0xff]  ;;  %v465_v6 = vld [vmem:[#allocation10 + $0x8] sm:$0xff]  ;;  %v1349_v7 = vpack.c.bf16 %v497_v4, %v496_v2  ;;  %v483_v10 = vld [vmem:[#allocation10 + $0x98] sm:$0xff]  ;;  %s2360_s12 = sld [smem:[#allocation27_spill]]  ;;  %s905_s18 = scalar_lea.sflag [#allocation4], %s2185_s6 }
  0xd4   : > { %v1319_v8 = vpack.c.bf16 %v465_v6, %v464_v5  ;;  %v498_v11 = vld [vmem:[#allocation10 + $0x110] sm:$0xff]  ;;  %1318 = vmatprep.subr.bf16.mxu0 %v1317_v3  ;;  %v1321_v12 = vpack.c.bf16 %v483_v10, %v482_v9  ;;  %v499_v13 = vld [vmem:[#allocation10 + $0x118] sm:$0xff]  ;;  %v484_v18 = vld [vmem:[#allocation10 + $0xa0] sm:$0xff]  ;;  %s1741_s17 = scalar_lea.vmem %s2243_s8, 512  ;;  %s1849_s24 = smov [#allocation13]  }
  0xd5   : > { %v466_v14 = vld [vmem:[#allocation10 + $0x10] sm:$0xff]  ;;  %v467_v15 = vld [vmem:[#allocation10 + $0x18] sm:$0xff]  ;;  %1350 = vmatprep.subr.bf16.mxu1 %v1349_v7  ;;  %v1353_v16 = vpack.c.bf16 %v499_v13, %v498_v11  ;;  %v485_v19 = vld [vmem:[#allocation10 + $0xa8] sm:$0xff]  ;;  %p1742_p0 = scmp.ne.s32.totalorder %s2243_s8, %s1741_s17  ;;  %s1745_s9 = sshll.u32 %s1849_s24, 4  ;;  %s1746_s9 = int_to_ptr.vmem [resolvable:$false] %s1745_s9 }
  0xd6   : > { %1320 = vmatpush3.bf16.msra.mxu0 %v1319_v8  ;;  %v1323_v17 = vpack.c.bf16 %v467_v15, %v466_v14  ;;  %v500_v20 = vld [vmem:[#allocation10 + $0x120] sm:$0xff]  ;;  %1352 = vmatpush3.bf16.msra.mxu1 %v1349_v7  ;;  %v1325_v21 = vpack.c.bf16 %v485_v19, %v484_v18  ;;  %v501_v22 = vld [vmem:[#allocation10 + $0x128] sm:$0xff]  ;;  %v486_v26 = vld [vmem:[#allocation10 + $0xb0] sm:$0xff]  ;;  %s1747_s13 = scalar_lea.vmem %s1746_s9, 1024  ;;  %p1748_p6 = scmp.lt.s32.totalorder %s2243_s8, %s1746_s9 }
  0xd7   : > { %1322 = vmatprep.subr.bf16.mxu0 %v1321_v12  ;;  %v468_v23 = vld [vmem:[#allocation10 + $0x20] sm:$0xff]  ;;  %v469_v24 = vld [vmem:[#allocation10 + $0x28] sm:$0xff]  ;;  %1354 = vmatprep.subr.bf16.mxu1 %v1353_v16  ;;  %v1357_v25 = vpack.c.bf16 %v501_v22, %v500_v20  ;;  %v487_v27 = vld [vmem:[#allocation10 + $0xb8] sm:$0xff]  ;;  %p2361_p10 = scmp.ne.s32.totalorder %s2359_s7, 0  ;;  %p1749_p11 = scmp.lt.s32.totalorder %s1747_s13, %s1741_s17 }
  0xd8   : > { %v502_v28 = vld [vmem:[#allocation10 + $0x130] sm:$0xff]  ;;  %v503_v29 = vld [vmem:[#allocation10 + $0x138] sm:$0xff]  ;;  %v1327_v30 = vpack.c.bf16 %v469_v24, %v468_v23  ;;  %v1329_v31 = vpack.c.bf16 %v487_v27, %v486_v26  ;;  %v488_v35 = vld [vmem:[#allocation10 + $0xc0] sm:$0xff] }
  0xd9   : > { %v470_v32 = vld [vmem:[#allocation10 + $0x30] sm:$0xff]  ;;  %v471_v33 = vld [vmem:[#allocation10 + $0x38] sm:$0xff]  ;;  %v1361_v34 = vpack.c.bf16 %v503_v29, %v502_v28  ;;  %v489_v36 = vld [vmem:[#allocation10 + $0xc8] sm:$0xff]  ;;  %s2248_s15 = scalar_lea.hbm %s2360_s12, %s1112_s14  ;;  %p1743_p2 = pnand %p1742_p0, %p2361_p10 }
  0xda   : > { %1324 = vmatpush3.bf16.msra.mxu0 %v1323_v17  ;;  %1356 = vmatpush3.bf16.msra.mxu1 %v1353_v16  ;;  %v504_v37 = vld [vmem:[#allocation10 + $0x140] sm:$0xff]  ;;  %v505_v38 = vld [vmem:[#allocation10 + $0x148] sm:$0xff]  ;;  %v1331_v39 = vpack.c.bf16 %v471_v33, %v470_v32  ;;  %v1333_v40 = vpack.c.bf16 %v489_v36, %v488_v35  ;;  %v490_v44 = vld [vmem:[#allocation10 + $0xd0] sm:$0xff]  ;;  %p1750_p8 = por %p1749_p11, %p1748_p6 }
  0xdb   : > { %1326 = vmatprep.subr.bf16.mxu0 %v1325_v21  ;;  %1358 = vmatprep.subr.bf16.mxu1 %v1357_v25  ;;  %v472_v41 = vld [vmem:[#allocation10 + $0x40] sm:$0xff]  ;;  %v473_v42 = vld [vmem:[#allocation10 + $0x48] sm:$0xff]  ;;  %v1365_v43 = vpack.c.bf16 %v505_v38, %v504_v37  ;;  %v491_v45 = vld [vmem:[#allocation10 + $0xd8] sm:$0xff]  ;;  %p1744_p13 = pneg %p1743_p2 }
  0xdc   : > { %v506_v46 = vld [vmem:[#allocation10 + $0x150] sm:$0xff]  ;;  %v507_v47 = vld [vmem:[#allocation10 + $0x158] sm:$0xff]  ;;  %v1335_v48 = vpack.c.bf16 %v473_v42, %v472_v41  ;;  %v453_v49 = vld [vmem:[%s2199_s3 + $0x8] sm:$0xff]  ;;  %v1337_v51 = vpack.c.bf16 %v491_v45, %v490_v44 }
  0xdd   : > { %v454_v50 = vld [vmem:[%s2199_s3 + $0x10] sm:$0xff]  ;;  %v475_v53 = vld [vmem:[#allocation10 + $0x58] sm:$0xff]  ;;  %v1369_v54 = vpack.c.bf16 %v507_v47, %v506_v46  ;;  %v492_v55 = vld [vmem:[#allocation10 + $0xe0] sm:$0xff]  ;;  %576 = vmatprep.mubr.f32.mxu0 %v453_v49  ;;  %p1751_p5 = pnand %p1750_p8, %p1744_p13 }
  0xde   : > { %1328 = vmatpush3.bf16.msra.mxu0 %v1327_v30  ;;  %1360 = vmatpush3.bf16.msra.mxu1 %v1357_v25  ;;  %v474_v52 = vld [vmem:[#allocation10 + $0x50] sm:$0xff]  ;;  %v493_v56 = vld [vmem:[#allocation10 + $0xe8] sm:$0xff]  ;;  %v508_v57 = vld [vmem:[#allocation10 + $0x160] sm:$0xff] }
  0xdf   : > { %1330 = vmatprep.subr.bf16.mxu0 %v1329_v31  ;;  %1362 = vmatprep.subr.bf16.mxu1 %v1361_v34  ;;  %v509_v58 = vld [vmem:[#allocation10 + $0x168] sm:$0xff]  ;;  %v1339_v59 = vpack.c.bf16 %v475_v53, %v474_v52  ;;  %v1341_v60 = vpack.c.bf16 %v493_v56, %v492_v55  ;;  %v476_v61 = vld [vmem:[#allocation10 + $0x60] sm:$0xff]  ;;  %v494_v0 = vld [vmem:[#allocation10 + $0xf0] sm:$0xff] }
  0xe0   : > { %1273 = vmatprep.mubr.f32.mxu1 %v454_v50  ;;  %v477_v62 = vld [vmem:[#allocation10 + $0x68] sm:$0xff]  ;;  %v1373_v63 = vpack.c.bf16 %v509_v58, %v508_v57  ;;  %v495_v1 = vld [vmem:[#allocation10 + $0xf8] sm:$0xff]  ;;  %v510_v2 = vld [vmem:[#allocation10 + $0x170] sm:$0xff] }
  0xe1   : > { %v511_v3 = vld [vmem:[#allocation10 + $0x178] sm:$0xff]  ;;  %v1343_v4 = vpack.c.bf16 %v477_v62, %v476_v61  ;;  %v1345_v5 = vpack.c.bf16 %v495_v1, %v494_v0  ;;  %v478_v6 = vld [vmem:[#allocation10 + $0x70] sm:$0xff]  ;;  %v791_v9 = vld [vmem:[#allocation11 + $0x80] sm:$0xff] }
  0xe2   : > { %1332 = vmatpush3.bf16.msra.mxu0 %v1331_v39  ;;  %1364 = vmatpush3.bf16.msra.mxu1 %v1361_v34  ;;  %v479_v7 = vld [vmem:[#allocation10 + $0x78] sm:$0xff]  ;;  %v1377_v8 = vpack.c.bf16 %v511_v3, %v510_v2  ;;  %v792_v10 = vld [vmem:[#allocation11 + $0x88] sm:$0xff]  ;;  %v436_v11 = vld [vmem:[#allocation8] sm:$0xff] }
  0xe3   : > { %1334 = vmatprep.subr.bf16.mxu0 %v1333_v40  ;;  %1366 = vmatprep.subr.bf16.mxu1 %v1365_v43  ;;  %v437_v12 = vld [vmem:[#allocation8 + $0x8] sm:$0xff]  ;;  %v1347_v13 = vpack.c.bf16 %v479_v7, %v478_v6  ;;  %v1413_v14 = vpack.c.bf16 %v792_v10, %v791_v9  ;;  %v775_v15 = vld [vmem:[#allocation11] sm:$0xff]  ;;  %v793_v18 = vld [vmem:[#allocation11 + $0x90] sm:$0xff] }
  0xe4   : > { %v776_v16 = vld [vmem:[#allocation11 + $0x8] sm:$0xff]  ;;  %v1381_v17 = vpack.c.bf16 %v437_v12, %v436_v11  ;;  %v794_v19 = vld [vmem:[#allocation11 + $0x98] sm:$0xff]  ;;  %v438_v20 = vld [vmem:[#allocation8 + $0x10] sm:$0xff] }
  0xe5   : > { %v439_v21 = vld [vmem:[#allocation8 + $0x18] sm:$0xff]  ;;  %v452_v22 = vld [vmem:[%s2199_s3] sm:$0xff]  ;;  %v1415_v23 = vpack.c.bf16 %v776_v16, %v775_v15  ;;  %v457_v24 = vld [vmem:[%s2199_s3 + $0x28] sm:$0xff]  ;;  %v1417_v25 = vpack.c.bf16 %v794_v19, %v793_v18 }
  0xe6   : > { %1336 = vmatpush3.bf16.msra.mxu0 %v1335_v48  ;;  %1368 = vmatpush3.bf16.msra.mxu1 %v1365_v43  ;;  %v777_v26 = vld [vmem:[#allocation11 + $0x10] sm:$0xff]  ;;  %v778_v27 = vld [vmem:[#allocation11 + $0x18] sm:$0xff]  ;;  %v1385_v28 = vpack.c.bf16 %v439_v21, %v438_v20  ;;  %v795_v29 = vld [vmem:[#allocation11 + $0xa0] sm:$0xff] }
  0xe7   : > { %1338 = vmatprep.subr.bf16.mxu0 %v1337_v51  ;;  %1370 = vmatprep.subr.bf16.mxu1 %v1369_v54  ;;  %v796_v30 = vld [vmem:[#allocation11 + $0xa8] sm:$0xff]  ;;  %v440_v31 = vld [vmem:[#allocation8 + $0x20] sm:$0xff]  ;;  %v1419_v34 = vpack.c.bf16 %v778_v27, %v777_v26  ;;  %v455_v35 = vld [vmem:[%s2199_s3 + $0x18] sm:$0xff] }
  0xe8   : > { %v441_v32 = vld [vmem:[#allocation8 + $0x28] sm:$0xff]  ;;  %v456_v33 = vld [vmem:[%s2199_s3 + $0x20] sm:$0xff]  ;;  %v1421_v37 = vpack.c.bf16 %v796_v30, %v795_v29  ;;  %v459_v40 = vld [vmem:[%s2199_s3 + $0x38] sm:$0xff] }
  0xe9   : > { %v460_v36 = vld [vmem:[%s2199_s3 + $0x40] sm:$0xff]  ;;  %v780_v39 = vld [vmem:[#allocation11 + $0x28] sm:$0xff]  ;;  %v1389_v41 = vpack.c.bf16 %v441_v32, %v440_v31  ;;  %v797_v42 = vld [vmem:[#allocation11 + $0xb0] sm:$0xff] }
  0xea   : > { %1340 = vmatpush3.bf16.msra.mxu0 %v1339_v59  ;;  %1372 = vmatpush3.bf16.msra.mxu1 %v1369_v54  ;;  %v779_v38 = vld [vmem:[#allocation11 + $0x20] sm:$0xff]  ;;  %v798_v43 = vld [vmem:[#allocation11 + $0xb8] sm:$0xff]  ;;  %v442_v44 = vld [vmem:[#allocation8 + $0x30] sm:$0xff] }
  0xeb   : > { %1342 = vmatprep.subr.bf16.mxu0 %v1341_v60  ;;  %1374 = vmatprep.subr.bf16.mxu1 %v1373_v63  ;;  %v443_v45 = vld [vmem:[#allocation8 + $0x38] sm:$0xff]  ;;  %v1423_v47 = vpack.c.bf16 %v780_v39, %v779_v38  ;;  %v458_v48 = vld [vmem:[%s2199_s3 + $0x30] sm:$0xff]  ;;  %v432_v49 = vld [vmem:[%s2191_s23] sm:$0xff]  ;;  %v1425_v50 = vpack.c.bf16 %v798_v43, %v797_v42 }
  0xec   : > { %v463_v46 = vld [vmem:[%s2199_s3 + $0x58] sm:$0xff]  ;;  %v781_v51 = vld [vmem:[#allocation11 + $0x30] sm:$0xff]  ;;  %v1393_v54 = vpack.c.bf16 %v443_v45, %v442_v44  ;;  %v799_v55 = vld [vmem:[#allocation11 + $0xc0] sm:$0xff] }
  0xed   : > { %v782_v52 = vld [vmem:[#allocation11 + $0x38] sm:$0xff]  ;;  %v462_v53 = vld [vmem:[%s2199_s3 + $0x50] sm:$0xff]  ;;  %v800_v56 = vld [vmem:[#allocation11 + $0xc8] sm:$0xff] }
  0xee   : > { %1344 = vmatpush3.bf16.msra.mxu0 %v1343_v4  ;;  %1376 = vmatpush3.bf16.msra.mxu1 %v1373_v63  ;;  %v444_v57 = vld [vmem:[#allocation8 + $0x40] sm:$0xff]  ;;  %v445_v58 = vld [vmem:[#allocation8 + $0x48] sm:$0xff]  ;;  %v1427_v59 = vpack.c.bf16 %v782_v52, %v781_v51  ;;  %v1429_v61 = vpack.c.bf16 %v800_v56, %v799_v55  ;;  %v801_v2 = vld [vmem:[#allocation11 + $0xd0] sm:$0xff] }
  0xef   : > { %1346 = vmatprep.subr.bf16.mxu0 %v1345_v5  ;;  %1378 = vmatprep.subr.bf16.mxu1 %v1377_v8  ;;  %v461_v60 = vld [vmem:[%s2199_s3 + $0x48] sm:$0xff]  ;;  %v783_v62 = vld [vmem:[#allocation11 + $0x40] sm:$0xff]  ;;  %v1397_v1 = vpack.c.bf16 %v445_v58, %v444_v57  ;;  %v802_v3 = vld [vmem:[#allocation11 + $0xd8] sm:$0xff] }
  0xf0   : > { %v784_v63 = vld [vmem:[#allocation11 + $0x48] sm:$0xff]  ;;  %v446_v4 = vld [vmem:[#allocation8 + $0x50] sm:$0xff]  ;;  %v447_v5 = vld [vmem:[#allocation8 + $0x58] sm:$0xff]  ;;  %v1433_v7 = vpack.c.bf16 %v802_v3, %v801_v2 }
  0xf1   : > { %v768_v0 = vld [vmem:[%s2206_s11 + $0x8] sm:$0xff]  ;;  %v1431_v6 = vpack.c.bf16 %v784_v63, %v783_v62  ;;  %v786_v9 = vld [vmem:[#allocation11 + $0x58] sm:$0xff]  ;;  %v1401_v10 = vpack.c.bf16 %v447_v5, %v446_v4  ;;  %v803_v11 = vld [vmem:[#allocation11 + $0xe0] sm:$0xff] }
  0xf2   : > { %1348 = vmatpush3.bf16.msra.mxu0 %v1347_v13  ;;  %1380 = vmatpush3.bf16.msra.mxu1 %v1377_v8  ;;  %v785_v8 = vld [vmem:[#allocation11 + $0x50] sm:$0xff]  ;;  %v804_v12 = vld [vmem:[#allocation11 + $0xe8] sm:$0xff]  ;;  %v448_v13 = vld [vmem:[#allocation8 + $0x60] sm:$0xff] }
  0xf3   : > { %1414 = vmatprep.subr.bf16.mxu0 %v1413_v14  ;;  %1382 = vmatprep.subr.bf16.mxu1 %v1381_v17  ;;  %v449_v14 = vld [vmem:[#allocation8 + $0x68] sm:$0xff]  ;;  %v1435_v15 = vpack.c.bf16 %v786_v9, %v785_v8  ;;  %v1437_v16 = vpack.c.bf16 %v804_v12, %v803_v11  ;;  %v805_v20 = vld [vmem:[#allocation11 + $0xf0] sm:$0xff]  ;;  %v806_v21 = vld [vmem:[#allocation11 + $0xf8] sm:$0xff] }
  0xf4   : > { %v788_v18 = vld [vmem:[#allocation11 + $0x68] sm:$0xff]  ;;  %v1405_v19 = vpack.c.bf16 %v449_v14, %v448_v13  ;;  %v789_v26 = vld [vmem:[#allocation11 + $0x70] sm:$0xff]  ;;  %v790_v27 = vld [vmem:[#allocation11 + $0x78] sm:$0xff] }
  0xf5   : > { %577 = vmatmul.mubr.f32.vlgmr.msra.gmra.mrb[0].mxu0 %v452_v22  ;;  %1274 = vmatmul.mubr.f32.vlgmr.msra.gmra.mrb[0].mxu1 %v457_v24  ;;  %v450_v22 = vld [vmem:[#allocation8 + $0x70] sm:$0xff]  ;;  %v1443_v29 = vpack.c.bf16 %v790_v27, %v789_v26  ;;  %v767_v30 = vld [vmem:[%s2206_s11] sm:$0xff]  ;;  %v433_v31 = vld [vmem:[%s2191_s23 + $0x8] sm:$0xff] }
  0xf6   : > { %1416 = vmatpush3.bf16.msra.mxu0 %v1415_v23  ;;  %1384 = vmatpush3.bf16.msra.mxu1 %v1381_v17  ;;  %v787_v17 = vld [vmem:[#allocation11 + $0x60] sm:$0xff]  ;;  %v451_v23 = vld [vmem:[#allocation8 + $0x78] sm:$0xff]  ;;  %v773_v39 = vld [vmem:[%s2206_s11 + $0x30] sm:$0xff] }
  0xf7   : > { %1418 = vmatprep.subr.bf16.mxu0 %v1417_v25  ;;  %1386 = vmatprep.subr.bf16.mxu1 %v1385_v28  ;;  %v1439_v24 = vpack.c.bf16 %v788_v18, %v787_v17  ;;  %v1441_v25 = vpack.c.bf16 %v806_v21, %v805_v20  ;;  %v770_v32 = vld [vmem:[%s2206_s11 + $0x18] sm:$0xff] }
  0xf8   : > { %581 = vmatprep.mubr.f32.mxu0 %v456_v33  ;;  %1276 = vmatprep.mubr.f32.mxu1 %v460_v36  ;;  %v434_v33 = vld [vmem:[%s2191_s23 + $0x10] sm:$0xff]  ;;  %v772_v36 = vld [vmem:[%s2206_s11 + $0x28] sm:$0xff]  ;;  %v774_v38 = vld [vmem:[%s2206_s11 + $0x38] sm:$0xff] }
  0xf9   : > { %582 = vmatmul.mubr.f32.gmra.mrb[2].mxu0 %v455_v35  ;;  %1277 = vmatmul.mubr.f32.gmra.mrb[2].mxu1 %v463_v46  ;;  %v435_v35 = vld [vmem:[%s2191_s23 + $0x18] sm:$0xff] }
  0xfa   : > { %1420 = vmatpush3.bf16.msra.mxu0 %v1419_v34  ;;  %586 = vmatprep.mubr.f32.mxu0 %v459_v40  ;;  %v769_v34 = vld [vmem:[%s2206_s11 + $0x10] sm:$0xff] }
  0xfb   : > { %1388 = vmatpush3.bf16.msra.mxu1 %v1385_v28  ;;  %1422 = vmatprep.subr.bf16.mxu0 %v1421_v37  ;;  %v1409_v28 = vpack.c.bf16 %v451_v23, %v450_v22  ;;  %v771_v37 = vld [vmem:[%s2206_s11 + $0x20] sm:$0xff] }
  0xfc   : > { %1390 = vmatprep.subr.bf16.mxu1 %v1389_v41  ;;  %1311 = vmatprep.mubr.f32.mxu1 %v432_v49 }
  0xfd   : > { %587 = vmatmul.mubr.f32.gmra.mrb[4].mxu0 %v458_v48 }
  0xfe   : > { %1424 = vmatpush3.bf16.msra.mxu0 %v1423_v47  ;;  %591 = vmatprep.mubr.f32.mxu0 %v462_v53 }
  0xff   : > { %1392 = vmatpush3.bf16.msra.mxu1 %v1389_v41  ;;  %1426 = vmatprep.subr.bf16.mxu0 %v1425_v50 }
 0x100   : > { %1394 = vmatprep.subr.bf16.mxu1 %v1393_v54 }
 0x101   : > { %592 = vmatmul.mubr.f32.gmra.mrb[6].mxu0 %v461_v60 }
 0x102   : > { %1428 = vmatpush3.bf16.msra.mxu0 %v1427_v59  ;;  %871 = vmatprep.mubr.f32.mxu0 %v768_v0 }
 0x103   : > { %1396 = vmatpush3.bf16.msra.mxu1 %v1393_v54  ;;  %1430 = vmatprep.subr.bf16.mxu0 %v1429_v61 }
 0x104   : > { %1398 = vmatprep.subr.bf16.mxu1 %v1397_v1 }
 0x106   : > { %1432 = vmatpush3.bf16.msra.mxu0 %v1431_v6 }
 0x107   : > { %1400 = vmatpush3.bf16.msra.mxu1 %v1397_v1  ;;  %1434 = vmatprep.subr.bf16.mxu0 %v1433_v7 }
 0x108   : > { %1402 = vmatprep.subr.bf16.mxu1 %v1401_v10 }
 0x10a   : > { %1436 = vmatpush3.bf16.msra.mxu0 %v1435_v15 }
 0x10b   : > { %1404 = vmatpush3.bf16.msra.mxu1 %v1401_v10  ;;  %1438 = vmatprep.subr.bf16.mxu0 %v1437_v16 }
 0x10c   : > { %1406 = vmatprep.subr.bf16.mxu1 %v1405_v19 }
 0x10e   : > { %1440 = vmatpush3.bf16.msra.mxu0 %v1439_v24 }
 0x10f   : > { %1408 = vmatpush3.bf16.msra.mxu1 %v1405_v19  ;;  %1442 = vmatprep.subr.bf16.mxu0 %v1441_v25 }
 0x110   : > { %1410 = vmatprep.subr.bf16.mxu1 %v1409_v28 }
 0x112   : > { %1444 = vmatpush3.bf16.msra.mxu0 %v1443_v29 }
 0x113   : > { %1412 = vmatpush3.bf16.msra.mxu1 %v1409_v28 }
 0x115   : > { %872 = vmatmul.mubr.f32.vlgmr.msra.gmra.mrb[8].mxu0 %v767_v30 }
 0x116   : > { %1312 = vmatmul.mubr.f32.vlgmr.msra.gmra.mrb[0].mxu1 %v433_v31  ;;  %876 = vmatprep.mubr.f32.mxu0 %v770_v32 }
 0x117   : > { %1314 = vmatprep.mubr.f32.mxu1 %v434_v33 }
 0x119   : > { %877 = vmatmul.mubr.f32.gmra.mrb[10].mxu0 %v769_v34 }
 0x11a   : > { %1315 = vmatmul.mubr.f32.gmra.mrb[2].mxu1 %v435_v35  ;;  %881 = vmatprep.mubr.f32.mxu0 %v772_v36 }
 0x11d   : > { %882 = vmatmul.mubr.f32.gmra.mrb[12].mxu0 %v771_v37 }
 0x11e   : > { %886 = vmatprep.mubr.f32.mxu0 %v774_v38 }
 0x121   : > { %887 = vmatmul.mubr.f32.gmra.mrb[14].mxu0 %v773_v39 }
 0x1c8   : > { %v1145_v40 = vpop.f32.mrb[0].mxu0 }
 0x1c9   : > { %v1146_v41 = vpop.f32.mrb[1].mxu0 }
 0x1ca   : > { %v1147_v42 = vadd.f32 %v1146_v41, %v1145_v40 }
 0x1cc   : > { %v1148_v43 = vpop.f32.mrb[2].mxu0 }
 0x1cd   : > { %v1149_v44 = vpop.f32.mrb[3].mxu0 }
 0x1ce   : > { %v1150_v45 = vadd.f32 %v1149_v44, %v1148_v43 }
 0x1d0   : > { %v1151_v46 = vpop.f32.mrb[4].mxu0 }
 0x1d1   : > { %v1152_v47 = vpop.f32.mrb[5].mxu0 }
 0x1d2   : > { %v1153_v48 = vadd.f32 %v1152_v47, %v1151_v46 }
 0x1d4   : > { %v1154_v49 = vpop.f32.mrb[6].mxu0 }
 0x1d5   : > { %v1155_v50 = vpop.f32.mrb[7].mxu0 }
 0x1d6   : > { %v1156_v51 = vadd.f32 %v1155_v50, %v1154_v49 }
 0x1e8   : > { %v1229_v52 = vpop.f32.mrb[8].mxu0 }
 0x1e9   : > { %v1313_v53 = vpop.f32.mrb[0].mxu1  ;;  %v1230_v54 = vpop.f32.mrb[9].mxu0 }
 0x1ea   : > { %v1445_v55 = vadd.f32 %v1313_v53, %v1150_v45  ;;  %v748_v56 = vpop.f32.mrb[1].mxu1  ;;  %v1231_v57 = vadd.f32 %v1230_v54, %v1229_v52 }
 0x1eb   : > { %v1446_v58 = vadd.f32 %v1147_v42, %v748_v56 }
 0x1ec   : > { %v1232_v59 = vpop.f32.mrb[10].mxu0 }
 0x1ed   : > { %v892_v60 = vadd.f32 %v1446_v58, %v1231_v57  ;;  %v1316_v61 = vpop.f32.mrb[2].mxu1  ;;  %v1233_v62 = vpop.f32.mrb[11].mxu0 }
 0x1ee   : > { %v1447_v63 = vadd.f32 %v1316_v61, %v1156_v51  ;;  %v758_v0 = vpop.f32.mrb[3].mxu1  ;;  %v1234_v1 = vadd.f32 %v1233_v62, %v1232_v59 }
 0x1ef   : > { %v896_v2 = vmax.f32 %v892_v60, 0.0  ;;  %v1448_v3 = vadd.f32 %v1153_v48, %v758_v0 }
 0x1f0   : > { %v893_v4 = vadd.f32 %v1445_v55, %v1234_v1  ;;  %v1235_v5 = vpop.f32.mrb[12].mxu0 }
 0x1f1   : > { %900 = vst [vmem:[%s427_s27] sm:$0xff] %v896_v2  ;;  %v1236_v6 = vpop.f32.mrb[13].mxu0 }
 0x1f2   : > { %v897_v7 = vmax.f32 %v893_v4, 0.0  ;;  %v1237_v8 = vadd.f32 %v1236_v6, %v1235_v5 }
 0x1f4   : > { %901 = vst [vmem:[%s427_s27 + $0x8] sm:$0xff] %v897_v7  ;;  %v894_v9 = vadd.f32 %v1448_v3, %v1237_v8  ;;  %v1238_v10 = vpop.f32.mrb[14].mxu0 }
 0x1f5   : > { %v1239_v11 = vpop.f32.mrb[15].mxu0 }
 0x1f6   : > { %v898_v12 = vmax.f32 %v894_v9, 0.0  ;;  %v1240_v13 = vadd.f32 %v1239_v11, %v1238_v10 }
 0x1f8   : > { %902 = vst [vmem:[%s427_s27 + $0x10] sm:$0xff] %v898_v12  ;;  %v895_v14 = vadd.f32 %v1447_v63, %v1240_v13 }
 0x1fa   : > { %v899_v15 = vmax.f32 %v895_v14, 0.0 }
 0x1fc   : > { %903 = vst [vmem:[%s427_s27 + $0x18] sm:$0xff] %v899_v15 }
 0x1fd   : > { %1754 = shalt.err (!%p1751_p5)
}
 0x1fe   : > { %s1755_s16 = scalar_lea.hbm %s2248_s15, 512  ;;  %s1759_s23 = scalar_lea.hbm %s2360_s12, 1024 }
 0x1ff   : > { %p1756_p9 = scmp.ne.s32.totalorder %s2248_s15, %s1755_s16  ;;  %p1760_p12 = scmp.lt.u32.totalorder %s2248_s15, %s2360_s12 }
 0x200   : > { %p1761_p1 = scmp.lt.u32.totalorder %s1759_s23, %s1755_s16  ;;  %p1763_p0 = scmp.lt.u32.totalorder %s1755_s16, %s2248_s15 }
 0x201   : > { %p1757_p3 = pnand %p1756_p9, %p2361_p10 }
 0x202   : > { %p1762_p4 = por %p1761_p1, %p1760_p12 }
 0x203   : > { %p1758_p7 = pneg %p1757_p3 }
 0x204   : > { %p1764_p2 = por %p1763_p0, %p1762_p4 }
 0x206   : > { %p1765_p13 = pnand %p1764_p2, %p1758_p7 }
 0x208   : > { %1768 = shalt.err (!%p1765_p13)
}
 0x209   : > { %s1850_s20 = smov 128   ;;  %s1851_s3 = smov 8  }
 0x20a   : > { %1474 = dma.vmem_to_hbm [thread:$0]  (%p2361_p10), %s2243_s8, 512, %s2248_s15, %s905_s18, %s1850_s20, %s1850_s20, %s1851_s3  }
 0x20b PF: > { %s2362_s30 = sld [smem:[#allocation19_spill]]  ;;  %s2363_s11 = sld [smem:[#allocation22_spill]] }
 0x20c   : > { %p2365_p11 = scmp.ge.s32.totalorder %s1835_s26, 2 }
 0x211   : > { %s934_s27 = sand.u32 1, %s2362_s30   ;;  %p2364_p6 = scmp.ne.s32.totalorder %s2363_s11, 0 }
 0x212   : > { %s935_s14 = scalar_lea.sflag [#allocation4], %s934_s27 }
 0x213   : > { %p1497_p8 = pnand %p2365_p11, %p2364_p6 }
 0x215   : > { %1810 = dma.done.wait (!%p1497_p8), %s935_s14, 512  }
 0x216   : > { %1812 = vsyncadd (!%p1497_p8), %s935_s14, 4294966784  ;;  %s27_s26 = sadd.s32 1, %s1835_s26   ;;  %s2366_s19 = sld [smem:[#allocation20_spill]] }
 0x217   : > { %p24_p5 = scmp.ge.s32.totalorder %s27_s26, 4   ;;  %s2367_s23 = sld [smem:[#allocation24_spill]] }
 0x218   : > { %s2368_s6 = sld [smem:[#allocation23_spill]]  ;;  %s2369_s21 = smov %s1819_s22 }
 0x219   : > { %s2371_s24 = smov %s1831_s25  ;;  %26 = sbr.rel (!%p24_p5) target bundleno = 14 (0xe), region = 128 }
 0x21c   : > { %s2370_s22 = smov %s2366_s19 }
 0x21e   : > { %s2372_s25 = smov %s2368_s6 }
 0x220   :  { %940 = vsyncpa [#allocation3], 1 }
 0x221   :  { %942 = vsyncpa [#allocation3 + $0x1], 1 }
 0x222   :  { %943 = vsyncpa [#allocation6], 1 }
 0x223   :  { %945 = vsyncpa [#allocation6 + $0x1], 1 }
 0x224   :  { %946 = vsyncpa [#allocation9], 1 }
 0x225   :  { %947 = vsyncpa [#allocation12], 1 }
 0x226   :  { %948 = vsyncpa [#allocation4], 1 }
 0x227   :  { %950 = vsyncpa [#allocation4 + $0x1], 1 }

</bundles_post_ra>
